<compile_context>
chip_gen: v5e
topology: v5e:2x2
jax: 0.10.0
libtpu: 0.0.40
codegen_flags: <defaults>
</compile_context>

<pallas_src>
from functools import partial

import jax
import jax.numpy as jnp
import numpy as np
from jax.experimental import pallas as pl
from jax.experimental.pallas import tpu as pltpu


# ------------------------------ fused kernel ------------------------------- #

def make_fused_kernel(num_layers, T, B, H, E):
    G = 8 * H                      # packed gate width: 4 gates x 2 dirs (=128 @ H=16)
    n_in = 1 + 3 * num_layers + 4  # x, per-layer (w_fused, whh, b), h0, c0, Wl, bl

    def kernel(*refs):
        x_ref = refs[0]                                           # (B, T, E)
        layer_refs = [refs[1 + 3 * l: 1 + 3 * (l + 1)] for l in range(num_layers)]
        h0_ref, c0_ref, lwt_ref, lb_ref = refs[1 + 3 * num_layers: n_in]
        out_ref = refs[n_in]                                      # (B, num_labels)
        act_scr = refs[n_in + 1]                                  # (T*8, 2H) VMEM slab

        if num_layers > 1:
            # One-time zero so the slab's padding rows/lanes feed clean zeros
            # into the next layer's hoisted matmul (off the serial chain).
            act_scr[...] = jnp.zeros_like(act_scr)

        feat_f = None          # fwd hidden at time T-1 (last layer)
        feat_b = None          # (full h at step 0; its bwd half is time T-1)

        for l in range(num_layers):
            w_ref, whh_ref, b_ref = layer_refs[l]
            bias = b_ref[...]                                     # (1, G)

            # -------- hoisted input->gate matmul: ONE fused dot, both dirs ----
            if l == 0:
                # batch-major rows: row = b*T + t  (layout-preserving reshape,
                # no transpose anywhere - neither in the wrapper nor here).
                lin = x_ref[...].reshape(B * T, E)
                xw = jnp.dot(lin, w_ref[...],
                             preferred_element_type=jnp.float32)  # (B*T, 2G)
                xw = xw.reshape(B, T, 2 * G)

                def pregate(s, xw=xw, bias=bias):
                    return xw[:, s, 0:G] + xw[:, T - 1 - s, G:2 * G] + bias
            else:
                # time-major slab: time t occupies rows 8t .. 8t+B-1.
                lin = act_scr[...]                                # (T*8, 2H)
                xw = jnp.dot(lin, w_ref[...],
                             preferred_element_type=jnp.float32)  # (T*8, 2G)

                def pregate(s, xw=xw, bias=bias):
                    rf = 8 * s
                    rb = 8 * (T - 1 - s)
                    return xw[rf:rf + B, 0:G] + xw[rb:rb + B, G:2 * G] + bias

            # Pre-gate term for EVERY step, built OFF the serial h-chain.
            pg = [pregate(s) for s in range(T)]

            whh = whh_ref[...]                 # (2H, G) block-diag [fwd | bwd]
            h = h0_ref[l]                      # (B, 2H)  [h_fwd | h_bwd]
            c = c0_ref[l]

            last = (l == num_layers - 1)
            h_step0 = None
            for s in range(T):                 # static unroll (T small & static)
                # serial chain: dot(h, whh) + pg[s] -> 2 EUP passes -> c, h
                gates = pg[s] + jnp.dot(h, whh,
                                        preferred_element_type=jnp.float32)
                # gate layout: [i_f i_b | f_f f_b | g_f g_b | o_f o_b]
                sig = jax.nn.sigmoid(gates)    # one full-vreg EUP pass
                th = jnp.tanh(gates)           # one full-vreg EUP pass
                i_g = sig[:, 0:2 * H]
                f_g = sig[:, 2 * H:4 * H]
                g_g = th[:, 4 * H:6 * H]
                o_g = sig[:, 6 * H:8 * H]
                c = f_g * c + i_g * g_g
                h = o_g * jnp.tanh(c)
                if last:
                    if s == 0:
                        h_step0 = h            # bwd half == output at time T-1
                else:
                    rf = 8 * s
                    rb = 8 * (T - 1 - s)
                    act_scr[rf:rf + B, 0:H] = h[:, 0:H]               # fwd @ t=s
                    act_scr[rb:rb + B, H:2 * H] = h[:, H:2 * H]       # bwd @ t=T-1-s
            if last:
                feat_f = h                     # fwd half == output at time T-1
                feat_b = h_step0

        # hidden2label fused: feat = [fwd(T-1) | bwd(T-1)] via a single lane
        # select (halves are already in their target lanes), then ONE dot.
        lane = jax.lax.broadcasted_iota(jnp.int32, (B, 2 * H), 1)
        feat = jnp.where(lane < H, feat_f, feat_b)
        out_ref[...] = (jnp.dot(feat, lwt_ref[...],
                                preferred_element_type=jnp.float32)
                        + lb_ref[...])

    return kernel


# ------------------------ one-time parameter packing ------------------------ #

def _scatter_gate_cols(mat_ifgo, d, H):
    """Scatter a (rows, 4H) [i|f|g|o] matrix of direction d into the packed
    (rows, 8H) column layout [i_f i_b | f_f f_b | g_f g_b | o_f o_b]."""
    rows = mat_ifgo.shape[0]
    out = np.zeros((rows, 8 * H), np.float32)
    for k in range(4):
        out[:, k * 2 * H + d * H: k * 2 * H + (d + 1) * H] = \
            mat_ifgo[:, k * H:(k + 1) * H]
    return out


def pack_params(lstm_params, label_w, label_b, num_layers, H):
    """Transpose, gate-pack, direction-fuse and bias-fold all weights ONCE."""
    layers = []
    for l in range(num_layers):
        w_halves = []
        whh_p = np.zeros((2 * H, 8 * H), np.float32)
        b_p = np.zeros((1, 8 * H), np.float32)
        for d in range(2):
            w_ih, w_hh, b_ih, b_hh = [np.asarray(p, np.float32)
                                      for p in lstm_params[(l, d)]]
            w_halves.append(_scatter_gate_cols(w_ih.T, d, H))
            whh_p[d * H:(d + 1) * H] = _scatter_gate_cols(w_hh.T, d, H)
            b_p += _scatter_gate_cols((b_ih + b_hh).reshape(1, -1), d, H)
        w_fused = np.concatenate(w_halves, axis=1)        # (in_dim, 16H)
        layers.append((jnp.asarray(w_fused), jnp.asarray(whh_p), jnp.asarray(b_p)))
    lwt = jnp.asarray(np.asarray(label_w, np.float32).T)              # (2H, L)
    lb = jnp.asarray(np.asarray(label_b, np.float32).reshape(1, -1))  # (1, L)
    return {"layers": layers, "label_wt": lwt, "label_b": lb}


def pack_hidden(h0, c0):
    """Pack PyTorch-layout (2*num_layers, B, H) states into per-layer [fwd|bwd]
    (num_layers, B, 2H) ONCE, outside the per-call path."""
    h0 = np.asarray(h0, np.float32)
    c0 = np.asarray(c0, np.float32)
    h0p = np.concatenate([h0[0::2], h0[1::2]], axis=-1)
    c0p = np.concatenate([c0[0::2], c0[1::2]], axis=-1)
    return jnp.asarray(h0p), jnp.asarray(c0p)


# --------------------------------- wrapper ---------------------------------- #

def _full_spec(shape):
    nd = len(shape)
    return pl.BlockSpec(shape, lambda i, nd=nd: (0,) * nd)


def roberta_cls_head_bilstm_forward(x_bte, h0p, c0p, packed, *, num_layers, H):
    """x_bte: (B, T, E) batch_first input (as in the PyTorch module).
    h0p/c0p: pre-packed (num_layers, B, 2H) states from pack_hidden()."""
    if x_bte.dtype != jnp.float32:          # static check; no op when already f32
        x_bte = x_bte.astype(jnp.float32)
    B, T, E = x_bte.shape
    L = packed["label_b"].shape[-1]

    args = [x_bte]
    for lp in packed["layers"]:
        args.extend(lp)
    args += [h0p, c0p, packed["label_wt"], packed["label_b"]]

    return pl.pallas_call(
        make_fused_kernel(num_layers, T, B, H, E),
        out_shape=jax.ShapeDtypeStruct((B, L), jnp.float32),
        grid=(1,),
        in_specs=[_full_spec(a.shape) for a in args],
        out_specs=_full_spec((B, L)),
        scratch_shapes=[pltpu.VMEM((T * 8, 2 * H), jnp.float32)],
        compiler_params=pltpu.CompilerParams(
            dimension_semantics=("arbitrary",)),
    )(*args)


# ----------------------------- numpy reference ------------------------------ #

def _sigmoid(x):
    return 1.0 / (1.0 + np.exp(-x))


def _np_lstm_dir(x, w_ih, w_hh, b_ih, b_hh, h0, c0):
    T = x.shape[0]
    H = h0.shape[-1]
    h, c = h0.copy(), c0.copy()
    outs = []
    for t in range(T):
        g = x[t] @ w_ih.T + h @ w_hh.T + b_ih + b_hh
        i = _sigmoid(g[:, :H]); f = _sigmoid(g[:, H:2 * H])
        gg = np.tanh(g[:, 2 * H:3 * H]); o = _sigmoid(g[:, 3 * H:])
        c = f * c + i * gg
        h = o * np.tanh(c)
        outs.append(h)
    return np.stack(outs, 0)


def _np_forward(x_bte, h0, c0, lstm_params, label_w, label_b, num_layers):
    layer_in = np.transpose(x_bte, (1, 0, 2))
    for layer in range(num_layers):
        outs = []
        for d in range(2):
            w_ih, w_hh, b_ih, b_hh = [np.asarray(p) for p in lstm_params[(layer, d)]]
            xin = layer_in if d == 0 else layer_in[::-1]
            out = _np_lstm_dir(xin, w_ih, w_hh, b_ih, b_hh,
                               h0[2 * layer + d], c0[2 * layer + d])
            if d == 1:
                out = out[::-1]
            outs.append(out)
        layer_in = np.concatenate(outs, axis=-1)
    last = layer_in[-1]
    return last @ np.asarray(label_w).T + np.asarray(label_b)


# ----------------------------------- main ------------------------------------ #

if __name__ == "__main__":
    # Synthetic "config" (small shapes)
    hidden_size = 16
    concat_last_n_hiddens = 2
    E = hidden_size * concat_last_n_hiddens       # LSTM input size = 32
    H = 16                                        # bilstm_hidden_size
    num_layers = 2                                # bilstm_num_layers
    num_labels = 3
    B, T = 2, 8

    key = jax.random.PRNGKey(0)
    keys = iter(jax.random.split(key, 64))
    bound = 1.0 / np.sqrt(H)

    lstm_params = {}
    for layer in range(num_layers):
        in_sz = E if layer == 0 else 2 * H
        for d in range(2):
            w_ih = jax.random.uniform(next(keys), (4 * H, in_sz), jnp.float32,
                                      -bound, bound)
            w_hh = jax.random.uniform(next(keys), (4 * H, H), jnp.float32,
                                      -bound, bound)
            b_ih = jax.random.uniform(next(keys), (4 * H,), jnp.float32,
                                      -bound, bound)
            b_hh = jax.random.uniform(next(keys), (4 * H,), jnp.float32,
                                      -bound, bound)
            lstm_params[(layer, d)] = (w_ih, w_hh, b_ih, b_hh)
    label_w = jax.random.uniform(next(keys), (num_labels, 2 * H), jnp.float32,
                                 -bound, bound)
    label_b = jax.random.uniform(next(keys), (num_labels,), jnp.float32,
                                 -bound, bound)

    x = jax.random.normal(next(keys), (B, T, E), jnp.float32)
    # Module's init_hidden gives zeros; use small random states here to also
    # exercise the h0/c0 handling of the fused kernel.
    h0 = 0.1 * jax.random.normal(next(keys), (2 * num_layers, B, H), jnp.float32)
    c0 = 0.1 * jax.random.normal(next(keys), (2 * num_layers, B, H), jnp.float32)

    packed = pack_params(lstm_params, label_w, label_b, num_layers, H)
    h0p, c0p = pack_hidden(h0, c0)          # one-time, outside the jitted call
    fwd = jax.jit(partial(roberta_cls_head_bilstm_forward,
                          num_layers=num_layers, H=H))

    logits = fwd(x, h0p, c0p, packed)
    logits = jax.block_until_ready(logits)

    ref = _np_forward(np.asarray(x), np.asarray(h0), np.asarray(c0),
                      lstm_params, label_w, label_b, num_layers)

    assert logits.shape == (B, num_labels), logits.shape
    # Tolerance tightened vs. the previous 2e-2.  It is bounded by the MXU's
    # default (bf16-input) matmul precision, which is deliberately kept on the
    # per-step h@whh dot so the 16-step serial chain stays short; any
    # packing/layout regression produces errors >~1e-1 and is still caught.
    assert np.allclose(np.asarray(logits), ref, atol=1e-2, rtol=1e-2), (
        np.max(np.abs(np.asarray(logits) - ref)))
    print("KERNEL_OK")
</pallas_src>

<mosaic_0001>
module attributes {stable_mosaic.version = 11 : i64} {
  func.func @kernel(%arg0: i32, %arg1: memref<2x8x32xf32, #tpu.memory_space<vmem>>, %arg2: memref<32x256xf32, #tpu.memory_space<vmem>>, %arg3: memref<32x128xf32, #tpu.memory_space<vmem>>, %arg4: memref<1x128xf32, #tpu.memory_space<vmem>>, %arg5: memref<32x256xf32, #tpu.memory_space<vmem>>, %arg6: memref<32x128xf32, #tpu.memory_space<vmem>>, %arg7: memref<1x128xf32, #tpu.memory_space<vmem>>, %arg8: memref<2x2x32xf32, #tpu.memory_space<vmem>>, %arg9: memref<2x2x32xf32, #tpu.memory_space<vmem>>, %arg10: memref<32x3xf32, #tpu.memory_space<vmem>>, %arg11: memref<1x3xf32, #tpu.memory_space<vmem>>, %arg12: memref<2x3xf32, #tpu.memory_space<vmem>>, %arg13: memref<64x32xf32, #tpu.memory_space<vmem>>) attributes {dimension_semantics = [#tpu.dimension_semantics<arbitrary>], iteration_bounds = array<i64: 1>, scalar_prefetch = 0 : i64, scratch_operands = 1 : i64, tpu.core_type = #tpu.core_type<tc>, window_params = [{pipeline_mode = #tpu.pipeline_mode<synchronous>, transform_indices = @transform_0, window_bounds = array<i64: 2, 8, 32>}, {pipeline_mode = #tpu.pipeline_mode<synchronous>, transform_indices = @transform_1, window_bounds = array<i64: 32, 256>}, {pipeline_mode = #tpu.pipeline_mode<synchronous>, transform_indices = @transform_2, window_bounds = array<i64: 32, 128>}, {pipeline_mode = #tpu.pipeline_mode<synchronous>, transform_indices = @transform_3, window_bounds = array<i64: 1, 128>}, {pipeline_mode = #tpu.pipeline_mode<synchronous>, transform_indices = @transform_4, window_bounds = array<i64: 32, 256>}, {pipeline_mode = #tpu.pipeline_mode<synchronous>, transform_indices = @transform_5, window_bounds = array<i64: 32, 128>}, {pipeline_mode = #tpu.pipeline_mode<synchronous>, transform_indices = @transform_6, window_bounds = array<i64: 1, 128>}, {pipeline_mode = #tpu.pipeline_mode<synchronous>, transform_indices = @transform_7, window_bounds = array<i64: 2, 2, 32>}, {pipeline_mode = #tpu.pipeline_mode<synchronous>, transform_indices = @transform_8, window_bounds = array<i64: 2, 2, 32>}, {pipeline_mode = #tpu.pipeline_mode<synchronous>, transform_indices = @transform_9, window_bounds = array<i64: 32, 3>}, {pipeline_mode = #tpu.pipeline_mode<synchronous>, transform_indices = @transform_10, window_bounds = array<i64: 1, 3>}, {pipeline_mode = #tpu.pipeline_mode<synchronous>, transform_indices = @transform_11, window_bounds = array<i64: 2, 3>}]} {
    %cst = arith.constant 0.000000e+00 : f32
    %0 = vector.broadcast %cst : f32 to vector<64x32xf32>
    %c0 = arith.constant 0 : index
    %c0_0 = arith.constant 0 : index
    %1 = vector.load %arg13[%c0, %c0_0] : memref<64x32xf32, #tpu.memory_space<vmem>>, vector<64x32xf32>
    tpu.vector_store %arg13[%c0, %c0_0], %0 {strides = array<i32>} : memref<64x32xf32, #tpu.memory_space<vmem>>, vector<64x32xf32>,
    %c0_1 = arith.constant 0 : index
    %c0_2 = arith.constant 0 : index
    %2 = vector.load %arg4[%c0_1, %c0_2] : memref<1x128xf32, #tpu.memory_space<vmem>>, vector<1x128xf32>
    %c0_3 = arith.constant 0 : index
    %c0_4 = arith.constant 0 : index
    %c0_5 = arith.constant 0 : index
    %3 = vector.load %arg1[%c0_3, %c0_4, %c0_5] : memref<2x8x32xf32, #tpu.memory_space<vmem>>, vector<2x8x32xf32>
    %4 = vector.shape_cast %3 : vector<2x8x32xf32> to vector<16x32xf32>
    %c0_6 = arith.constant 0 : index
    %c0_7 = arith.constant 0 : index
    %5 = vector.load %arg2[%c0_6, %c0_7] : memref<32x256xf32, #tpu.memory_space<vmem>>, vector<32x256xf32>
    %cst_8 = arith.constant dense<0.000000e+00> : vector<16x256xf32>
    %6 = tpu.matmul %4, %5, %cst_8 {dimension_numbers = #tpu.dot_dimension_numbers<[1], [0], [0], [1], [0, 0, 1, 1], [], []>} : vector<16x32xf32>, vector<32x256xf32>, vector<16x256xf32> -> vector<16x256xf32>
    %7 = vector.shape_cast %6 : vector<16x256xf32> to vector<2x8x256xf32>
    %8 = vector.extract_strided_slice %7 {offsets = [0, 0, 0], sizes = [2, 1, 128], strides = [1, 1, 1]} : vector<2x8x256xf32> to vector<2x1x128xf32>
    %9 = vector.shape_cast %8 : vector<2x1x128xf32> to vector<2x128xf32>
    %10 = vector.extract_strided_slice %7 {offsets = [0, 7, 128], sizes = [2, 1, 128], strides = [1, 1, 1]} : vector<2x8x256xf32> to vector<2x1x128xf32>
    %11 = vector.shape_cast %10 : vector<2x1x128xf32> to vector<2x128xf32>
    %12 = arith.addf %9, %11 : vector<2x128xf32>
    %13 = vector.broadcast %2 : vector<1x128xf32> to vector<2x128xf32>
    %14 = arith.addf %12, %13 : vector<2x128xf32>
    %15 = vector.extract_strided_slice %7 {offsets = [0, 1, 0], sizes = [2, 1, 128], strides = [1, 1, 1]} : vector<2x8x256xf32> to vector<2x1x128xf32>
    %16 = vector.shape_cast %15 : vector<2x1x128xf32> to vector<2x128xf32>
    %17 = vector.extract_strided_slice %7 {offsets = [0, 6, 128], sizes = [2, 1, 128], strides = [1, 1, 1]} : vector<2x8x256xf32> to vector<2x1x128xf32>
    %18 = vector.shape_cast %17 : vector<2x1x128xf32> to vector<2x128xf32>
    %19 = arith.addf %16, %18 : vector<2x128xf32>
    %20 = vector.broadcast %2 : vector<1x128xf32> to vector<2x128xf32>
    %21 = arith.addf %19, %20 : vector<2x128xf32>
    %22 = vector.extract_strided_slice %7 {offsets = [0, 2, 0], sizes = [2, 1, 128], strides = [1, 1, 1]} : vector<2x8x256xf32> to vector<2x1x128xf32>
    %23 = vector.shape_cast %22 : vector<2x1x128xf32> to vector<2x128xf32>
    %24 = vector.extract_strided_slice %7 {offsets = [0, 5, 128], sizes = [2, 1, 128], strides = [1, 1, 1]} : vector<2x8x256xf32> to vector<2x1x128xf32>
    %25 = vector.shape_cast %24 : vector<2x1x128xf32> to vector<2x128xf32>
    %26 = arith.addf %23, %25 : vector<2x128xf32>
    %27 = vector.broadcast %2 : vector<1x128xf32> to vector<2x128xf32>
    %28 = arith.addf %26, %27 : vector<2x128xf32>
    %29 = vector.extract_strided_slice %7 {offsets = [0, 3, 0], sizes = [2, 1, 128], strides = [1, 1, 1]} : vector<2x8x256xf32> to vector<2x1x128xf32>
    %30 = vector.shape_cast %29 : vector<2x1x128xf32> to vector<2x128xf32>
    %31 = vector.extract_strided_slice %7 {offsets = [0, 4, 128], sizes = [2, 1, 128], strides = [1, 1, 1]} : vector<2x8x256xf32> to vector<2x1x128xf32>
    %32 = vector.shape_cast %31 : vector<2x1x128xf32> to vector<2x128xf32>
    %33 = arith.addf %30, %32 : vector<2x128xf32>
    %34 = vector.broadcast %2 : vector<1x128xf32> to vector<2x128xf32>
    %35 = arith.addf %33, %34 : vector<2x128xf32>
    %36 = vector.extract_strided_slice %7 {offsets = [0, 4, 0], sizes = [2, 1, 128], strides = [1, 1, 1]} : vector<2x8x256xf32> to vector<2x1x128xf32>
    %37 = vector.shape_cast %36 : vector<2x1x128xf32> to vector<2x128xf32>
    %38 = vector.extract_strided_slice %7 {offsets = [0, 3, 128], sizes = [2, 1, 128], strides = [1, 1, 1]} : vector<2x8x256xf32> to vector<2x1x128xf32>
    %39 = vector.shape_cast %38 : vector<2x1x128xf32> to vector<2x128xf32>
    %40 = arith.addf %37, %39 : vector<2x128xf32>
    %41 = vector.broadcast %2 : vector<1x128xf32> to vector<2x128xf32>
    %42 = arith.addf %40, %41 : vector<2x128xf32>
    %43 = vector.extract_strided_slice %7 {offsets = [0, 5, 0], sizes = [2, 1, 128], strides = [1, 1, 1]} : vector<2x8x256xf32> to vector<2x1x128xf32>
    %44 = vector.shape_cast %43 : vector<2x1x128xf32> to vector<2x128xf32>
    %45 = vector.extract_strided_slice %7 {offsets = [0, 2, 128], sizes = [2, 1, 128], strides = [1, 1, 1]} : vector<2x8x256xf32> to vector<2x1x128xf32>
    %46 = vector.shape_cast %45 : vector<2x1x128xf32> to vector<2x128xf32>
    %47 = arith.addf %44, %46 : vector<2x128xf32>
    %48 = vector.broadcast %2 : vector<1x128xf32> to vector<2x128xf32>
    %49 = arith.addf %47, %48 : vector<2x128xf32>
    %50 = vector.extract_strided_slice %7 {offsets = [0, 6, 0], sizes = [2, 1, 128], strides = [1, 1, 1]} : vector<2x8x256xf32> to vector<2x1x128xf32>
    %51 = vector.shape_cast %50 : vector<2x1x128xf32> to vector<2x128xf32>
    %52 = vector.extract_strided_slice %7 {offsets = [0, 1, 128], sizes = [2, 1, 128], strides = [1, 1, 1]} : vector<2x8x256xf32> to vector<2x1x128xf32>
    %53 = vector.shape_cast %52 : vector<2x1x128xf32> to vector<2x128xf32>
    %54 = arith.addf %51, %53 : vector<2x128xf32>
    %55 = vector.broadcast %2 : vector<1x128xf32> to vector<2x128xf32>
    %56 = arith.addf %54, %55 : vector<2x128xf32>
    %57 = vector.extract_strided_slice %7 {offsets = [0, 7, 0], sizes = [2, 1, 128], strides = [1, 1, 1]} : vector<2x8x256xf32> to vector<2x1x128xf32>
    %58 = vector.shape_cast %57 : vector<2x1x128xf32> to vector<2x128xf32>
    %59 = vector.extract_strided_slice %7 {offsets = [0, 0, 128], sizes = [2, 1, 128], strides = [1, 1, 1]} : vector<2x8x256xf32> to vector<2x1x128xf32>
    %60 = vector.shape_cast %59 : vector<2x1x128xf32> to vector<2x128xf32>
    %61 = arith.addf %58, %60 : vector<2x128xf32>
    %62 = vector.broadcast %2 : vector<1x128xf32> to vector<2x128xf32>
    %63 = arith.addf %61, %62 : vector<2x128xf32>
    %c0_9 = arith.constant 0 : index
    %c0_10 = arith.constant 0 : index
    %64 = vector.load %arg3[%c0_9, %c0_10] : memref<32x128xf32, #tpu.memory_space<vmem>>, vector<32x128xf32>
    %c0_11 = arith.constant 0 : index
    %c0_12 = arith.constant 0 : index
    %c0_13 = arith.constant 0 : index
    %65 = vector.load %arg8[%c0_11, %c0_12, %c0_13] : memref<2x2x32xf32, #tpu.memory_space<vmem>>, vector<1x2x32xf32>
    %66 = vector.shape_cast %65 : vector<1x2x32xf32> to vector<2x32xf32>
    %c0_14 = arith.constant 0 : index
    %c0_15 = arith.constant 0 : index
    %c0_16 = arith.constant 0 : index
    %67 = vector.load %arg9[%c0_14, %c0_15, %c0_16] : memref<2x2x32xf32, #tpu.memory_space<vmem>>, vector<1x2x32xf32>
    %68 = vector.shape_cast %67 : vector<1x2x32xf32> to vector<2x32xf32>
    %cst_17 = arith.constant dense<0.000000e+00> : vector<2x128xf32>
    %69 = tpu.matmul %66, %64, %cst_17 {dimension_numbers = #tpu.dot_dimension_numbers<[1], [0], [0], [1], [0, 0, 1, 1], [], []>} : vector<2x32xf32>, vector<32x128xf32>, vector<2x128xf32> -> vector<2x128xf32>
    %70 = arith.addf %14, %69 : vector<2x128xf32>
    %71 = arith.negf %70 : vector<2x128xf32>
    %72 = math.exp %71 : vector<2x128xf32>
    %cst_18 = arith.constant 1.000000e+00 : f32
    %73 = vector.broadcast %cst_18 : f32 to vector<2x128xf32>
    %74 = arith.addf %73, %72 : vector<2x128xf32>
    %75 = arith.divf %73, %74 : vector<2x128xf32>
    %76 = math.tanh %70 : vector<2x128xf32>
    %77 = vector.extract_strided_slice %75 {offsets = [0, 0], sizes = [2, 32], strides = [1, 1]} : vector<2x128xf32> to vector<2x32xf32>
    %78 = vector.extract_strided_slice %75 {offsets = [0, 32], sizes = [2, 32], strides = [1, 1]} : vector<2x128xf32> to vector<2x32xf32>
    %79 = vector.extract_strided_slice %76 {offsets = [0, 64], sizes = [2, 32], strides = [1, 1]} : vector<2x128xf32> to vector<2x32xf32>
    %80 = vector.extract_strided_slice %75 {offsets = [0, 96], sizes = [2, 32], strides = [1, 1]} : vector<2x128xf32> to vector<2x32xf32>
    %81 = arith.mulf %78, %68 : vector<2x32xf32>
    %82 = arith.mulf %77, %79 : vector<2x32xf32>
    %83 = arith.addf %81, %82 : vector<2x32xf32>
    %84 = math.tanh %83 : vector<2x32xf32>
    %85 = arith.mulf %80, %84 : vector<2x32xf32>
    %86 = vector.extract_strided_slice %85 {offsets = [0, 0], sizes = [2, 16], strides = [1, 1]} : vector<2x32xf32> to vector<2x16xf32>
    %c0_19 = arith.constant 0 : index
    %c0_20 = arith.constant 0 : index
    %87 = vector.load %arg13[%c0_19, %c0_20] : memref<64x32xf32, #tpu.memory_space<vmem>>, vector<2x16xf32>
    tpu.vector_store %arg13[%c0_19, %c0_20], %86 {strides = array<i32>} : memref<64x32xf32, #tpu.memory_space<vmem>>, vector<2x16xf32>,
    %88 = vector.extract_strided_slice %85 {offsets = [0, 16], sizes = [2, 16], strides = [1, 1]} : vector<2x32xf32> to vector<2x16xf32>
    %c56 = arith.constant 56 : index
    %c16 = arith.constant 16 : index
    %89 = vector.load %arg13[%c56, %c16] : memref<64x32xf32, #tpu.memory_space<vmem>>, vector<2x16xf32>
    tpu.vector_store %arg13[%c56, %c16], %88 {strides = array<i32>} : memref<64x32xf32, #tpu.memory_space<vmem>>, vector<2x16xf32>,
    %cst_21 = arith.constant dense<0.000000e+00> : vector<2x128xf32>
    %90 = tpu.matmul %85, %64, %cst_21 {dimension_numbers = #tpu.dot_dimension_numbers<[1], [0], [0], [1], [0, 0, 1, 1], [], []>} : vector<2x32xf32>, vector<32x128xf32>, vector<2x128xf32> -> vector<2x128xf32>
    %91 = arith.addf %21, %90 : vector<2x128xf32>
    %92 = arith.negf %91 : vector<2x128xf32>
    %93 = math.exp %92 : vector<2x128xf32>
    %cst_22 = arith.constant 1.000000e+00 : f32
    %94 = vector.broadcast %cst_22 : f32 to vector<2x128xf32>
    %95 = arith.addf %94, %93 : vector<2x128xf32>
    %96 = arith.divf %94, %95 : vector<2x128xf32>
    %97 = math.tanh %91 : vector<2x128xf32>
    %98 = vector.extract_strided_slice %96 {offsets = [0, 0], sizes = [2, 32], strides = [1, 1]} : vector<2x128xf32> to vector<2x32xf32>
    %99 = vector.extract_strided_slice %96 {offsets = [0, 32], sizes = [2, 32], strides = [1, 1]} : vector<2x128xf32> to vector<2x32xf32>
    %100 = vector.extract_strided_slice %97 {offsets = [0, 64], sizes = [2, 32], strides = [1, 1]} : vector<2x128xf32> to vector<2x32xf32>
    %101 = vector.extract_strided_slice %96 {offsets = [0, 96], sizes = [2, 32], strides = [1, 1]} : vector<2x128xf32> to vector<2x32xf32>
    %102 = arith.mulf %99, %83 : vector<2x32xf32>
    %103 = arith.mulf %98, %100 : vector<2x32xf32>
    %104 = arith.addf %102, %103 : vector<2x32xf32>
    %105 = math.tanh %104 : vector<2x32xf32>
    %106 = arith.mulf %101, %105 : vector<2x32xf32>
    %107 = vector.extract_strided_slice %106 {offsets = [0, 0], sizes = [2, 16], strides = [1, 1]} : vector<2x32xf32> to vector<2x16xf32>
    %c8 = arith.constant 8 : index
    %c0_23 = arith.constant 0 : index
    %108 = vector.load %arg13[%c8, %c0_23] : memref<64x32xf32, #tpu.memory_space<vmem>>, vector<2x16xf32>
    tpu.vector_store %arg13[%c8, %c0_23], %107 {strides = array<i32>} : memref<64x32xf32, #tpu.memory_space<vmem>>, vector<2x16xf32>,
    %109 = vector.extract_strided_slice %106 {offsets = [0, 16], sizes = [2, 16], strides = [1, 1]} : vector<2x32xf32> to vector<2x16xf32>
    %c48 = arith.constant 48 : index
    %c16_24 = arith.constant 16 : index
    %110 = vector.load %arg13[%c48, %c16_24] : memref<64x32xf32, #tpu.memory_space<vmem>>, vector<2x16xf32>
    tpu.vector_store %arg13[%c48, %c16_24], %109 {strides = array<i32>} : memref<64x32xf32, #tpu.memory_space<vmem>>, vector<2x16xf32>,
    %cst_25 = arith.constant dense<0.000000e+00> : vector<2x128xf32>
    %111 = tpu.matmul %106, %64, %cst_25 {dimension_numbers = #tpu.dot_dimension_numbers<[1], [0], [0], [1], [0, 0, 1, 1], [], []>} : vector<2x32xf32>, vector<32x128xf32>, vector<2x128xf32> -> vector<2x128xf32>
    %112 = arith.addf %28, %111 : vector<2x128xf32>
    %113 = arith.negf %112 : vector<2x128xf32>
    %114 = math.exp %113 : vector<2x128xf32>
    %cst_26 = arith.constant 1.000000e+00 : f32
    %115 = vector.broadcast %cst_26 : f32 to vector<2x128xf32>
    %116 = arith.addf %115, %114 : vector<2x128xf32>
    %117 = arith.divf %115, %116 : vector<2x128xf32>
    %118 = math.tanh %112 : vector<2x128xf32>
    %119 = vector.extract_strided_slice %117 {offsets = [0, 0], sizes = [2, 32], strides = [1, 1]} : vector<2x128xf32> to vector<2x32xf32>
    %120 = vector.extract_strided_slice %117 {offsets = [0, 32], sizes = [2, 32], strides = [1, 1]} : vector<2x128xf32> to vector<2x32xf32>
    %121 = vector.extract_strided_slice %118 {offsets = [0, 64], sizes = [2, 32], strides = [1, 1]} : vector<2x128xf32> to vector<2x32xf32>
    %122 = vector.extract_strided_slice %117 {offsets = [0, 96], sizes = [2, 32], strides = [1, 1]} : vector<2x128xf32> to vector<2x32xf32>
    %123 = arith.mulf %120, %104 : vector<2x32xf32>
    %124 = arith.mulf %119, %121 : vector<2x32xf32>
    %125 = arith.addf %123, %124 : vector<2x32xf32>
    %126 = math.tanh %125 : vector<2x32xf32>
    %127 = arith.mulf %122, %126 : vector<2x32xf32>
    %128 = vector.extract_strided_slice %127 {offsets = [0, 0], sizes = [2, 16], strides = [1, 1]} : vector<2x32xf32> to vector<2x16xf32>
    %c16_27 = arith.constant 16 : index
    %c0_28 = arith.constant 0 : index
    %129 = vector.load %arg13[%c16_27, %c0_28] : memref<64x32xf32, #tpu.memory_space<vmem>>, vector<2x16xf32>
    tpu.vector_store %arg13[%c16_27, %c0_28], %128 {strides = array<i32>} : memref<64x32xf32, #tpu.memory_space<vmem>>, vector<2x16xf32>,
    %130 = vector.extract_strided_slice %127 {offsets = [0, 16], sizes = [2, 16], strides = [1, 1]} : vector<2x32xf32> to vector<2x16xf32>
    %c40 = arith.constant 40 : index
    %c16_29 = arith.constant 16 : index
    %131 = vector.load %arg13[%c40, %c16_29] : memref<64x32xf32, #tpu.memory_space<vmem>>, vector<2x16xf32>
    tpu.vector_store %arg13[%c40, %c16_29], %130 {strides = array<i32>} : memref<64x32xf32, #tpu.memory_space<vmem>>, vector<2x16xf32>,
    %cst_30 = arith.constant dense<0.000000e+00> : vector<2x128xf32>
    %132 = tpu.matmul %127, %64, %cst_30 {dimension_numbers = #tpu.dot_dimension_numbers<[1], [0], [0], [1], [0, 0, 1, 1], [], []>} : vector<2x32xf32>, vector<32x128xf32>, vector<2x128xf32> -> vector<2x128xf32>
    %133 = arith.addf %35, %132 : vector<2x128xf32>
    %134 = arith.negf %133 : vector<2x128xf32>
    %135 = math.exp %134 : vector<2x128xf32>
    %cst_31 = arith.constant 1.000000e+00 : f32
    %136 = vector.broadcast %cst_31 : f32 to vector<2x128xf32>
    %137 = arith.addf %136, %135 : vector<2x128xf32>
    %138 = arith.divf %136, %137 : vector<2x128xf32>
    %139 = math.tanh %133 : vector<2x128xf32>
    %140 = vector.extract_strided_slice %138 {offsets = [0, 0], sizes = [2, 32], strides = [1, 1]} : vector<2x128xf32> to vector<2x32xf32>
    %141 = vector.extract_strided_slice %138 {offsets = [0, 32], sizes = [2, 32], strides = [1, 1]} : vector<2x128xf32> to vector<2x32xf32>
    %142 = vector.extract_strided_slice %139 {offsets = [0, 64], sizes = [2, 32], strides = [1, 1]} : vector<2x128xf32> to vector<2x32xf32>
    %143 = vector.extract_strided_slice %138 {offsets = [0, 96], sizes = [2, 32], strides = [1, 1]} : vector<2x128xf32> to vector<2x32xf32>
    %144 = arith.mulf %141, %125 : vector<2x32xf32>
    %145 = arith.mulf %140, %142 : vector<2x32xf32>
    %146 = arith.addf %144, %145 : vector<2x32xf32>
    %147 = math.tanh %146 : vector<2x32xf32>
    %148 = arith.mulf %143, %147 : vector<2x32xf32>
    %149 = vector.extract_strided_slice %148 {offsets = [0, 0], sizes = [2, 16], strides = [1, 1]} : vector<2x32xf32> to vector<2x16xf32>
    %c24 = arith.constant 24 : index
    %c0_32 = arith.constant 0 : index
    %150 = vector.load %arg13[%c24, %c0_32] : memref<64x32xf32, #tpu.memory_space<vmem>>, vector<2x16xf32>
    tpu.vector_store %arg13[%c24, %c0_32], %149 {strides = array<i32>} : memref<64x32xf32, #tpu.memory_space<vmem>>, vector<2x16xf32>,
    %151 = vector.extract_strided_slice %148 {offsets = [0, 16], sizes = [2, 16], strides = [1, 1]} : vector<2x32xf32> to vector<2x16xf32>
    %c32 = arith.constant 32 : index
    %c16_33 = arith.constant 16 : index
    %152 = vector.load %arg13[%c32, %c16_33] : memref<64x32xf32, #tpu.memory_space<vmem>>, vector<2x16xf32>
    tpu.vector_store %arg13[%c32, %c16_33], %151 {strides = array<i32>} : memref<64x32xf32, #tpu.memory_space<vmem>>, vector<2x16xf32>,
    %cst_34 = arith.constant dense<0.000000e+00> : vector<2x128xf32>
    %153 = tpu.matmul %148, %64, %cst_34 {dimension_numbers = #tpu.dot_dimension_numbers<[1], [0], [0], [1], [0, 0, 1, 1], [], []>} : vector<2x32xf32>, vector<32x128xf32>, vector<2x128xf32> -> vector<2x128xf32>
    %154 = arith.addf %42, %153 : vector<2x128xf32>
    %155 = arith.negf %154 : vector<2x128xf32>
    %156 = math.exp %155 : vector<2x128xf32>
    %cst_35 = arith.constant 1.000000e+00 : f32
    %157 = vector.broadcast %cst_35 : f32 to vector<2x128xf32>
    %158 = arith.addf %157, %156 : vector<2x128xf32>
    %159 = arith.divf %157, %158 : vector<2x128xf32>
    %160 = math.tanh %154 : vector<2x128xf32>
    %161 = vector.extract_strided_slice %159 {offsets = [0, 0], sizes = [2, 32], strides = [1, 1]} : vector<2x128xf32> to vector<2x32xf32>
    %162 = vector.extract_strided_slice %159 {offsets = [0, 32], sizes = [2, 32], strides = [1, 1]} : vector<2x128xf32> to vector<2x32xf32>
    %163 = vector.extract_strided_slice %160 {offsets = [0, 64], sizes = [2, 32], strides = [1, 1]} : vector<2x128xf32> to vector<2x32xf32>
    %164 = vector.extract_strided_slice %159 {offsets = [0, 96], sizes = [2, 32], strides = [1, 1]} : vector<2x128xf32> to vector<2x32xf32>
    %165 = arith.mulf %162, %146 : vector<2x32xf32>
    %166 = arith.mulf %161, %163 : vector<2x32xf32>
    %167 = arith.addf %165, %166 : vector<2x32xf32>
    %168 = math.tanh %167 : vector<2x32xf32>
    %169 = arith.mulf %164, %168 : vector<2x32xf32>
    %170 = vector.extract_strided_slice %169 {offsets = [0, 0], sizes = [2, 16], strides = [1, 1]} : vector<2x32xf32> to vector<2x16xf32>
    %c32_36 = arith.constant 32 : index
    %c0_37 = arith.constant 0 : index
    %171 = vector.load %arg13[%c32_36, %c0_37] : memref<64x32xf32, #tpu.memory_space<vmem>>, vector<2x16xf32>
    tpu.vector_store %arg13[%c32_36, %c0_37], %170 {strides = array<i32>} : memref<64x32xf32, #tpu.memory_space<vmem>>, vector<2x16xf32>,
    %172 = vector.extract_strided_slice %169 {offsets = [0, 16], sizes = [2, 16], strides = [1, 1]} : vector<2x32xf32> to vector<2x16xf32>
    %c24_38 = arith.constant 24 : index
    %c16_39 = arith.constant 16 : index
    %173 = vector.load %arg13[%c24_38, %c16_39] : memref<64x32xf32, #tpu.memory_space<vmem>>, vector<2x16xf32>
    tpu.vector_store %arg13[%c24_38, %c16_39], %172 {strides = array<i32>} : memref<64x32xf32, #tpu.memory_space<vmem>>, vector<2x16xf32>,
    %cst_40 = arith.constant dense<0.000000e+00> : vector<2x128xf32>
    %174 = tpu.matmul %169, %64, %cst_40 {dimension_numbers = #tpu.dot_dimension_numbers<[1], [0], [0], [1], [0, 0, 1, 1], [], []>} : vector<2x32xf32>, vector<32x128xf32>, vector<2x128xf32> -> vector<2x128xf32>
    %175 = arith.addf %49, %174 : vector<2x128xf32>
    %176 = arith.negf %175 : vector<2x128xf32>
    %177 = math.exp %176 : vector<2x128xf32>
    %cst_41 = arith.constant 1.000000e+00 : f32
    %178 = vector.broadcast %cst_41 : f32 to vector<2x128xf32>
    %179 = arith.addf %178, %177 : vector<2x128xf32>
    %180 = arith.divf %178, %179 : vector<2x128xf32>
    %181 = math.tanh %175 : vector<2x128xf32>
    %182 = vector.extract_strided_slice %180 {offsets = [0, 0], sizes = [2, 32], strides = [1, 1]} : vector<2x128xf32> to vector<2x32xf32>
    %183 = vector.extract_strided_slice %180 {offsets = [0, 32], sizes = [2, 32], strides = [1, 1]} : vector<2x128xf32> to vector<2x32xf32>
    %184 = vector.extract_strided_slice %181 {offsets = [0, 64], sizes = [2, 32], strides = [1, 1]} : vector<2x128xf32> to vector<2x32xf32>
    %185 = vector.extract_strided_slice %180 {offsets = [0, 96], sizes = [2, 32], strides = [1, 1]} : vector<2x128xf32> to vector<2x32xf32>
    %186 = arith.mulf %183, %167 : vector<2x32xf32>
    %187 = arith.mulf %182, %184 : vector<2x32xf32>
    %188 = arith.addf %186, %187 : vector<2x32xf32>
    %189 = math.tanh %188 : vector<2x32xf32>
    %190 = arith.mulf %185, %189 : vector<2x32xf32>
    %191 = vector.extract_strided_slice %190 {offsets = [0, 0], sizes = [2, 16], strides = [1, 1]} : vector<2x32xf32> to vector<2x16xf32>
    %c40_42 = arith.constant 40 : index
    %c0_43 = arith.constant 0 : index
    %192 = vector.load %arg13[%c40_42, %c0_43] : memref<64x32xf32, #tpu.memory_space<vmem>>, vector<2x16xf32>
    tpu.vector_store %arg13[%c40_42, %c0_43], %191 {strides = array<i32>} : memref<64x32xf32, #tpu.memory_space<vmem>>, vector<2x16xf32>,
    %193 = vector.extract_strided_slice %190 {offsets = [0, 16], sizes = [2, 16], strides = [1, 1]} : vector<2x32xf32> to vector<2x16xf32>
    %c16_44 = arith.constant 16 : index
    %c16_45 = arith.constant 16 : index
    %194 = vector.load %arg13[%c16_44, %c16_45] : memref<64x32xf32, #tpu.memory_space<vmem>>, vector<2x16xf32>
    tpu.vector_store %arg13[%c16_44, %c16_45], %193 {strides = array<i32>} : memref<64x32xf32, #tpu.memory_space<vmem>>, vector<2x16xf32>,
    %cst_46 = arith.constant dense<0.000000e+00> : vector<2x128xf32>
    %195 = tpu.matmul %190, %64, %cst_46 {dimension_numbers = #tpu.dot_dimension_numbers<[1], [0], [0], [1], [0, 0, 1, 1], [], []>} : vector<2x32xf32>, vector<32x128xf32>, vector<2x128xf32> -> vector<2x128xf32>
    %196 = arith.addf %56, %195 : vector<2x128xf32>
    %197 = arith.negf %196 : vector<2x128xf32>
    %198 = math.exp %197 : vector<2x128xf32>
    %cst_47 = arith.constant 1.000000e+00 : f32
    %199 = vector.broadcast %cst_47 : f32 to vector<2x128xf32>
    %200 = arith.addf %199, %198 : vector<2x128xf32>
    %201 = arith.divf %199, %200 : vector<2x128xf32>
    %202 = math.tanh %196 : vector<2x128xf32>
    %203 = vector.extract_strided_slice %201 {offsets = [0, 0], sizes = [2, 32], strides = [1, 1]} : vector<2x128xf32> to vector<2x32xf32>
    %204 = vector.extract_strided_slice %201 {offsets = [0, 32], sizes = [2, 32], strides = [1, 1]} : vector<2x128xf32> to vector<2x32xf32>
    %205 = vector.extract_strided_slice %202 {offsets = [0, 64], sizes = [2, 32], strides = [1, 1]} : vector<2x128xf32> to vector<2x32xf32>
    %206 = vector.extract_strided_slice %201 {offsets = [0, 96], sizes = [2, 32], strides = [1, 1]} : vector<2x128xf32> to vector<2x32xf32>
    %207 = arith.mulf %204, %188 : vector<2x32xf32>
    %208 = arith.mulf %203, %205 : vector<2x32xf32>
    %209 = arith.addf %207, %208 : vector<2x32xf32>
    %210 = math.tanh %209 : vector<2x32xf32>
    %211 = arith.mulf %206, %210 : vector<2x32xf32>
    %212 = vector.extract_strided_slice %211 {offsets = [0, 0], sizes = [2, 16], strides = [1, 1]} : vector<2x32xf32> to vector<2x16xf32>
    %c48_48 = arith.constant 48 : index
    %c0_49 = arith.constant 0 : index
    %213 = vector.load %arg13[%c48_48, %c0_49] : memref<64x32xf32, #tpu.memory_space<vmem>>, vector<2x16xf32>
    tpu.vector_store %arg13[%c48_48, %c0_49], %212 {strides = array<i32>} : memref<64x32xf32, #tpu.memory_space<vmem>>, vector<2x16xf32>,
    %214 = vector.extract_strided_slice %211 {offsets = [0, 16], sizes = [2, 16], strides = [1, 1]} : vector<2x32xf32> to vector<2x16xf32>
    %c8_50 = arith.constant 8 : index
    %c16_51 = arith.constant 16 : index
    %215 = vector.load %arg13[%c8_50, %c16_51] : memref<64x32xf32, #tpu.memory_space<vmem>>, vector<2x16xf32>
    tpu.vector_store %arg13[%c8_50, %c16_51], %214 {strides = array<i32>} : memref<64x32xf32, #tpu.memory_space<vmem>>, vector<2x16xf32>,
    %cst_52 = arith.constant dense<0.000000e+00> : vector<2x128xf32>
    %216 = tpu.matmul %211, %64, %cst_52 {dimension_numbers = #tpu.dot_dimension_numbers<[1], [0], [0], [1], [0, 0, 1, 1], [], []>} : vector<2x32xf32>, vector<32x128xf32>, vector<2x128xf32> -> vector<2x128xf32>
    %217 = arith.addf %63, %216 : vector<2x128xf32>
    %218 = arith.negf %217 : vector<2x128xf32>
    %219 = math.exp %218 : vector<2x128xf32>
    %cst_53 = arith.constant 1.000000e+00 : f32
    %220 = vector.broadcast %cst_53 : f32 to vector<2x128xf32>
    %221 = arith.addf %220, %219 : vector<2x128xf32>
    %222 = arith.divf %220, %221 : vector<2x128xf32>
    %223 = math.tanh %217 : vector<2x128xf32>
    %224 = vector.extract_strided_slice %222 {offsets = [0, 0], sizes = [2, 32], strides = [1, 1]} : vector<2x128xf32> to vector<2x32xf32>
    %225 = vector.extract_strided_slice %222 {offsets = [0, 32], sizes = [2, 32], strides = [1, 1]} : vector<2x128xf32> to vector<2x32xf32>
    %226 = vector.extract_strided_slice %223 {offsets = [0, 64], sizes = [2, 32], strides = [1, 1]} : vector<2x128xf32> to vector<2x32xf32>
    %227 = vector.extract_strided_slice %222 {offsets = [0, 96], sizes = [2, 32], strides = [1, 1]} : vector<2x128xf32> to vector<2x32xf32>
    %228 = arith.mulf %225, %209 : vector<2x32xf32>
    %229 = arith.mulf %224, %226 : vector<2x32xf32>
    %230 = arith.addf %228, %229 : vector<2x32xf32>
    %231 = math.tanh %230 : vector<2x32xf32>
    %232 = arith.mulf %227, %231 : vector<2x32xf32>
    %233 = vector.extract_strided_slice %232 {offsets = [0, 0], sizes = [2, 16], strides = [1, 1]} : vector<2x32xf32> to vector<2x16xf32>
    %c56_54 = arith.constant 56 : index
    %c0_55 = arith.constant 0 : index
    %234 = vector.load %arg13[%c56_54, %c0_55] : memref<64x32xf32, #tpu.memory_space<vmem>>, vector<2x16xf32>
    tpu.vector_store %arg13[%c56_54, %c0_55], %233 {strides = array<i32>} : memref<64x32xf32, #tpu.memory_space<vmem>>, vector<2x16xf32>,
    %235 = vector.extract_strided_slice %232 {offsets = [0, 16], sizes = [2, 16], strides = [1, 1]} : vector<2x32xf32> to vector<2x16xf32>
    %c0_56 = arith.constant 0 : index
    %c16_57 = arith.constant 16 : index
    %236 = vector.load %arg13[%c0_56, %c16_57] : memref<64x32xf32, #tpu.memory_space<vmem>>, vector<2x16xf32>
    tpu.vector_store %arg13[%c0_56, %c16_57], %235 {strides = array<i32>} : memref<64x32xf32, #tpu.memory_space<vmem>>, vector<2x16xf32>,
    %c0_58 = arith.constant 0 : index
    %c0_59 = arith.constant 0 : index
    %237 = vector.load %arg7[%c0_58, %c0_59] : memref<1x128xf32, #tpu.memory_space<vmem>>, vector<1x128xf32>
    %c0_60 = arith.constant 0 : index
    %c0_61 = arith.constant 0 : index
    %238 = vector.load %arg13[%c0_60, %c0_61] : memref<64x32xf32, #tpu.memory_space<vmem>>, vector<64x32xf32>
    %c0_62 = arith.constant 0 : index
    %c0_63 = arith.constant 0 : index
    %239 = vector.load %arg5[%c0_62, %c0_63] : memref<32x256xf32, #tpu.memory_space<vmem>>, vector<32x256xf32>
    %cst_64 = arith.constant dense<0.000000e+00> : vector<64x256xf32>
    %240 = tpu.matmul %238, %239, %cst_64 {dimension_numbers = #tpu.dot_dimension_numbers<[1], [0], [0], [1], [0, 0, 1, 1], [], []>} : vector<64x32xf32>, vector<32x256xf32>, vector<64x256xf32> -> vector<64x256xf32>
    %241 = vector.extract_strided_slice %240 {offsets = [0, 0], sizes = [2, 128], strides = [1, 1]} : vector<64x256xf32> to vector<2x128xf32>
    %242 = vector.extract_strided_slice %240 {offsets = [56, 128], sizes = [2, 128], strides = [1, 1]} : vector<64x256xf32> to vector<2x128xf32>
    %243 = arith.addf %241, %242 : vector<2x128xf32>
    %244 = vector.broadcast %237 : vector<1x128xf32> to vector<2x128xf32>
    %245 = arith.addf %243, %244 : vector<2x128xf32>
    %246 = vector.extract_strided_slice %240 {offsets = [8, 0], sizes = [2, 128], strides = [1, 1]} : vector<64x256xf32> to vector<2x128xf32>
    %247 = vector.extract_strided_slice %240 {offsets = [48, 128], sizes = [2, 128], strides = [1, 1]} : vector<64x256xf32> to vector<2x128xf32>
    %248 = arith.addf %246, %247 : vector<2x128xf32>
    %249 = vector.broadcast %237 : vector<1x128xf32> to vector<2x128xf32>
    %250 = arith.addf %248, %249 : vector<2x128xf32>
    %251 = vector.extract_strided_slice %240 {offsets = [16, 0], sizes = [2, 128], strides = [1, 1]} : vector<64x256xf32> to vector<2x128xf32>
    %252 = vector.extract_strided_slice %240 {offsets = [40, 128], sizes = [2, 128], strides = [1, 1]} : vector<64x256xf32> to vector<2x128xf32>
    %253 = arith.addf %251, %252 : vector<2x128xf32>
    %254 = vector.broadcast %237 : vector<1x128xf32> to vector<2x128xf32>
    %255 = arith.addf %253, %254 : vector<2x128xf32>
    %256 = vector.extract_strided_slice %240 {offsets = [24, 0], sizes = [2, 128], strides = [1, 1]} : vector<64x256xf32> to vector<2x128xf32>
    %257 = vector.extract_strided_slice %240 {offsets = [32, 128], sizes = [2, 128], strides = [1, 1]} : vector<64x256xf32> to vector<2x128xf32>
    %258 = arith.addf %256, %257 : vector<2x128xf32>
    %259 = vector.broadcast %237 : vector<1x128xf32> to vector<2x128xf32>
    %260 = arith.addf %258, %259 : vector<2x128xf32>
    %261 = vector.extract_strided_slice %240 {offsets = [32, 0], sizes = [2, 128], strides = [1, 1]} : vector<64x256xf32> to vector<2x128xf32>
    %262 = vector.extract_strided_slice %240 {offsets = [24, 128], sizes = [2, 128], strides = [1, 1]} : vector<64x256xf32> to vector<2x128xf32>
    %263 = arith.addf %261, %262 : vector<2x128xf32>
    %264 = vector.broadcast %237 : vector<1x128xf32> to vector<2x128xf32>
    %265 = arith.addf %263, %264 : vector<2x128xf32>
    %266 = vector.extract_strided_slice %240 {offsets = [40, 0], sizes = [2, 128], strides = [1, 1]} : vector<64x256xf32> to vector<2x128xf32>
    %267 = vector.extract_strided_slice %240 {offsets = [16, 128], sizes = [2, 128], strides = [1, 1]} : vector<64x256xf32> to vector<2x128xf32>
    %268 = arith.addf %266, %267 : vector<2x128xf32>
    %269 = vector.broadcast %237 : vector<1x128xf32> to vector<2x128xf32>
    %270 = arith.addf %268, %269 : vector<2x128xf32>
    %271 = vector.extract_strided_slice %240 {offsets = [48, 0], sizes = [2, 128], strides = [1, 1]} : vector<64x256xf32> to vector<2x128xf32>
    %272 = vector.extract_strided_slice %240 {offsets = [8, 128], sizes = [2, 128], strides = [1, 1]} : vector<64x256xf32> to vector<2x128xf32>
    %273 = arith.addf %271, %272 : vector<2x128xf32>
    %274 = vector.broadcast %237 : vector<1x128xf32> to vector<2x128xf32>
    %275 = arith.addf %273, %274 : vector<2x128xf32>
    %276 = vector.extract_strided_slice %240 {offsets = [56, 0], sizes = [2, 128], strides = [1, 1]} : vector<64x256xf32> to vector<2x128xf32>
    %277 = vector.extract_strided_slice %240 {offsets = [0, 128], sizes = [2, 128], strides = [1, 1]} : vector<64x256xf32> to vector<2x128xf32>
    %278 = arith.addf %276, %277 : vector<2x128xf32>
    %279 = vector.broadcast %237 : vector<1x128xf32> to vector<2x128xf32>
    %280 = arith.addf %278, %279 : vector<2x128xf32>
    %c0_65 = arith.constant 0 : index
    %c0_66 = arith.constant 0 : index
    %281 = vector.load %arg6[%c0_65, %c0_66] : memref<32x128xf32, #tpu.memory_space<vmem>>, vector<32x128xf32>
    %c1 = arith.constant 1 : index
    %c0_67 = arith.constant 0 : index
    %c0_68 = arith.constant 0 : index
    %282 = vector.load %arg8[%c1, %c0_67, %c0_68] : memref<2x2x32xf32, #tpu.memory_space<vmem>>, vector<1x2x32xf32>
    %283 = vector.shape_cast %282 : vector<1x2x32xf32> to vector<2x32xf32>
    %c1_69 = arith.constant 1 : index
    %c0_70 = arith.constant 0 : index
    %c0_71 = arith.constant 0 : index
    %284 = vector.load %arg9[%c1_69, %c0_70, %c0_71] : memref<2x2x32xf32, #tpu.memory_space<vmem>>, vector<1x2x32xf32>
    %285 = vector.shape_cast %284 : vector<1x2x32xf32> to vector<2x32xf32>
    %cst_72 = arith.constant dense<0.000000e+00> : vector<2x128xf32>
    %286 = tpu.matmul %283, %281, %cst_72 {dimension_numbers = #tpu.dot_dimension_numbers<[1], [0], [0], [1], [0, 0, 1, 1], [], []>} : vector<2x32xf32>, vector<32x128xf32>, vector<2x128xf32> -> vector<2x128xf32>
    %287 = arith.addf %245, %286 : vector<2x128xf32>
    %288 = arith.negf %287 : vector<2x128xf32>
    %289 = math.exp %288 : vector<2x128xf32>
    %cst_73 = arith.constant 1.000000e+00 : f32
    %290 = vector.broadcast %cst_73 : f32 to vector<2x128xf32>
    %291 = arith.addf %290, %289 : vector<2x128xf32>
    %292 = arith.divf %290, %291 : vector<2x128xf32>
    %293 = math.tanh %287 : vector<2x128xf32>
    %294 = vector.extract_strided_slice %292 {offsets = [0, 0], sizes = [2, 32], strides = [1, 1]} : vector<2x128xf32> to vector<2x32xf32>
    %295 = vector.extract_strided_slice %292 {offsets = [0, 32], sizes = [2, 32], strides = [1, 1]} : vector<2x128xf32> to vector<2x32xf32>
    %296 = vector.extract_strided_slice %293 {offsets = [0, 64], sizes = [2, 32], strides = [1, 1]} : vector<2x128xf32> to vector<2x32xf32>
    %297 = vector.extract_strided_slice %292 {offsets = [0, 96], sizes = [2, 32], strides = [1, 1]} : vector<2x128xf32> to vector<2x32xf32>
    %298 = arith.mulf %295, %285 : vector<2x32xf32>
    %299 = arith.mulf %294, %296 : vector<2x32xf32>
    %300 = arith.addf %298, %299 : vector<2x32xf32>
    %301 = math.tanh %300 : vector<2x32xf32>
    %302 = arith.mulf %297, %301 : vector<2x32xf32>
    %cst_74 = arith.constant dense<0.000000e+00> : vector<2x128xf32>
    %303 = tpu.matmul %302, %281, %cst_74 {dimension_numbers = #tpu.dot_dimension_numbers<[1], [0], [0], [1], [0, 0, 1, 1], [], []>} : vector<2x32xf32>, vector<32x128xf32>, vector<2x128xf32> -> vector<2x128xf32>
    %304 = arith.addf %250, %303 : vector<2x128xf32>
    %305 = arith.negf %304 : vector<2x128xf32>
    %306 = math.exp %305 : vector<2x128xf32>
    %cst_75 = arith.constant 1.000000e+00 : f32
    %307 = vector.broadcast %cst_75 : f32 to vector<2x128xf32>
    %308 = arith.addf %307, %306 : vector<2x128xf32>
    %309 = arith.divf %307, %308 : vector<2x128xf32>
    %310 = math.tanh %304 : vector<2x128xf32>
    %311 = vector.extract_strided_slice %309 {offsets = [0, 0], sizes = [2, 32], strides = [1, 1]} : vector<2x128xf32> to vector<2x32xf32>
    %312 = vector.extract_strided_slice %309 {offsets = [0, 32], sizes = [2, 32], strides = [1, 1]} : vector<2x128xf32> to vector<2x32xf32>
    %313 = vector.extract_strided_slice %310 {offsets = [0, 64], sizes = [2, 32], strides = [1, 1]} : vector<2x128xf32> to vector<2x32xf32>
    %314 = vector.extract_strided_slice %309 {offsets = [0, 96], sizes = [2, 32], strides = [1, 1]} : vector<2x128xf32> to vector<2x32xf32>
    %315 = arith.mulf %312, %300 : vector<2x32xf32>
    %316 = arith.mulf %311, %313 : vector<2x32xf32>
    %317 = arith.addf %315, %316 : vector<2x32xf32>
    %318 = math.tanh %317 : vector<2x32xf32>
    %319 = arith.mulf %314, %318 : vector<2x32xf32>
    %cst_76 = arith.constant dense<0.000000e+00> : vector<2x128xf32>
    %320 = tpu.matmul %319, %281, %cst_76 {dimension_numbers = #tpu.dot_dimension_numbers<[1], [0], [0], [1], [0, 0, 1, 1], [], []>} : vector<2x32xf32>, vector<32x128xf32>, vector<2x128xf32> -> vector<2x128xf32>
    %321 = arith.addf %255, %320 : vector<2x128xf32>
    %322 = arith.negf %321 : vector<2x128xf32>
    %323 = math.exp %322 : vector<2x128xf32>
    %cst_77 = arith.constant 1.000000e+00 : f32
    %324 = vector.broadcast %cst_77 : f32 to vector<2x128xf32>
    %325 = arith.addf %324, %323 : vector<2x128xf32>
    %326 = arith.divf %324, %325 : vector<2x128xf32>
    %327 = math.tanh %321 : vector<2x128xf32>
    %328 = vector.extract_strided_slice %326 {offsets = [0, 0], sizes = [2, 32], strides = [1, 1]} : vector<2x128xf32> to vector<2x32xf32>
    %329 = vector.extract_strided_slice %326 {offsets = [0, 32], sizes = [2, 32], strides = [1, 1]} : vector<2x128xf32> to vector<2x32xf32>
    %330 = vector.extract_strided_slice %327 {offsets = [0, 64], sizes = [2, 32], strides = [1, 1]} : vector<2x128xf32> to vector<2x32xf32>
    %331 = vector.extract_strided_slice %326 {offsets = [0, 96], sizes = [2, 32], strides = [1, 1]} : vector<2x128xf32> to vector<2x32xf32>
    %332 = arith.mulf %329, %317 : vector<2x32xf32>
    %333 = arith.mulf %328, %330 : vector<2x32xf32>
    %334 = arith.addf %332, %333 : vector<2x32xf32>
    %335 = math.tanh %334 : vector<2x32xf32>
    %336 = arith.mulf %331, %335 : vector<2x32xf32>
    %cst_78 = arith.constant dense<0.000000e+00> : vector<2x128xf32>
    %337 = tpu.matmul %336, %281, %cst_78 {dimension_numbers = #tpu.dot_dimension_numbers<[1], [0], [0], [1], [0, 0, 1, 1], [], []>} : vector<2x32xf32>, vector<32x128xf32>, vector<2x128xf32> -> vector<2x128xf32>
    %338 = arith.addf %260, %337 : vector<2x128xf32>
    %339 = arith.negf %338 : vector<2x128xf32>
    %340 = math.exp %339 : vector<2x128xf32>
    %cst_79 = arith.constant 1.000000e+00 : f32
    %341 = vector.broadcast %cst_79 : f32 to vector<2x128xf32>
    %342 = arith.addf %341, %340 : vector<2x128xf32>
    %343 = arith.divf %341, %342 : vector<2x128xf32>
    %344 = math.tanh %338 : vector<2x128xf32>
    %345 = vector.extract_strided_slice %343 {offsets = [0, 0], sizes = [2, 32], strides = [1, 1]} : vector<2x128xf32> to vector<2x32xf32>
    %346 = vector.extract_strided_slice %343 {offsets = [0, 32], sizes = [2, 32], strides = [1, 1]} : vector<2x128xf32> to vector<2x32xf32>
    %347 = vector.extract_strided_slice %344 {offsets = [0, 64], sizes = [2, 32], strides = [1, 1]} : vector<2x128xf32> to vector<2x32xf32>
    %348 = vector.extract_strided_slice %343 {offsets = [0, 96], sizes = [2, 32], strides = [1, 1]} : vector<2x128xf32> to vector<2x32xf32>
    %349 = arith.mulf %346, %334 : vector<2x32xf32>
    %350 = arith.mulf %345, %347 : vector<2x32xf32>
    %351 = arith.addf %349, %350 : vector<2x32xf32>
    %352 = math.tanh %351 : vector<2x32xf32>
    %353 = arith.mulf %348, %352 : vector<2x32xf32>
    %cst_80 = arith.constant dense<0.000000e+00> : vector<2x128xf32>
    %354 = tpu.matmul %353, %281, %cst_80 {dimension_numbers = #tpu.dot_dimension_numbers<[1], [0], [0], [1], [0, 0, 1, 1], [], []>} : vector<2x32xf32>, vector<32x128xf32>, vector<2x128xf32> -> vector<2x128xf32>
    %355 = arith.addf %265, %354 : vector<2x128xf32>
    %356 = arith.negf %355 : vector<2x128xf32>
    %357 = math.exp %356 : vector<2x128xf32>
    %cst_81 = arith.constant 1.000000e+00 : f32
    %358 = vector.broadcast %cst_81 : f32 to vector<2x128xf32>
    %359 = arith.addf %358, %357 : vector<2x128xf32>
    %360 = arith.divf %358, %359 : vector<2x128xf32>
    %361 = math.tanh %355 : vector<2x128xf32>
    %362 = vector.extract_strided_slice %360 {offsets = [0, 0], sizes = [2, 32], strides = [1, 1]} : vector<2x128xf32> to vector<2x32xf32>
    %363 = vector.extract_strided_slice %360 {offsets = [0, 32], sizes = [2, 32], strides = [1, 1]} : vector<2x128xf32> to vector<2x32xf32>
    %364 = vector.extract_strided_slice %361 {offsets = [0, 64], sizes = [2, 32], strides = [1, 1]} : vector<2x128xf32> to vector<2x32xf32>
    %365 = vector.extract_strided_slice %360 {offsets = [0, 96], sizes = [2, 32], strides = [1, 1]} : vector<2x128xf32> to vector<2x32xf32>
    %366 = arith.mulf %363, %351 : vector<2x32xf32>
    %367 = arith.mulf %362, %364 : vector<2x32xf32>
    %368 = arith.addf %366, %367 : vector<2x32xf32>
    %369 = math.tanh %368 : vector<2x32xf32>
    %370 = arith.mulf %365, %369 : vector<2x32xf32>
    %cst_82 = arith.constant dense<0.000000e+00> : vector<2x128xf32>
    %371 = tpu.matmul %370, %281, %cst_82 {dimension_numbers = #tpu.dot_dimension_numbers<[1], [0], [0], [1], [0, 0, 1, 1], [], []>} : vector<2x32xf32>, vector<32x128xf32>, vector<2x128xf32> -> vector<2x128xf32>
    %372 = arith.addf %270, %371 : vector<2x128xf32>
    %373 = arith.negf %372 : vector<2x128xf32>
    %374 = math.exp %373 : vector<2x128xf32>
    %cst_83 = arith.constant 1.000000e+00 : f32
    %375 = vector.broadcast %cst_83 : f32 to vector<2x128xf32>
    %376 = arith.addf %375, %374 : vector<2x128xf32>
    %377 = arith.divf %375, %376 : vector<2x128xf32>
    %378 = math.tanh %372 : vector<2x128xf32>
    %379 = vector.extract_strided_slice %377 {offsets = [0, 0], sizes = [2, 32], strides = [1, 1]} : vector<2x128xf32> to vector<2x32xf32>
    %380 = vector.extract_strided_slice %377 {offsets = [0, 32], sizes = [2, 32], strides = [1, 1]} : vector<2x128xf32> to vector<2x32xf32>
    %381 = vector.extract_strided_slice %378 {offsets = [0, 64], sizes = [2, 32], strides = [1, 1]} : vector<2x128xf32> to vector<2x32xf32>
    %382 = vector.extract_strided_slice %377 {offsets = [0, 96], sizes = [2, 32], strides = [1, 1]} : vector<2x128xf32> to vector<2x32xf32>
    %383 = arith.mulf %380, %368 : vector<2x32xf32>
    %384 = arith.mulf %379, %381 : vector<2x32xf32>
    %385 = arith.addf %383, %384 : vector<2x32xf32>
    %386 = math.tanh %385 : vector<2x32xf32>
    %387 = arith.mulf %382, %386 : vector<2x32xf32>
    %cst_84 = arith.constant dense<0.000000e+00> : vector<2x128xf32>
    %388 = tpu.matmul %387, %281, %cst_84 {dimension_numbers = #tpu.dot_dimension_numbers<[1], [0], [0], [1], [0, 0, 1, 1], [], []>} : vector<2x32xf32>, vector<32x128xf32>, vector<2x128xf32> -> vector<2x128xf32>
    %389 = arith.addf %275, %388 : vector<2x128xf32>
    %390 = arith.negf %389 : vector<2x128xf32>
    %391 = math.exp %390 : vector<2x128xf32>
    %cst_85 = arith.constant 1.000000e+00 : f32
    %392 = vector.broadcast %cst_85 : f32 to vector<2x128xf32>
    %393 = arith.addf %392, %391 : vector<2x128xf32>
    %394 = arith.divf %392, %393 : vector<2x128xf32>
    %395 = math.tanh %389 : vector<2x128xf32>
    %396 = vector.extract_strided_slice %394 {offsets = [0, 0], sizes = [2, 32], strides = [1, 1]} : vector<2x128xf32> to vector<2x32xf32>
    %397 = vector.extract_strided_slice %394 {offsets = [0, 32], sizes = [2, 32], strides = [1, 1]} : vector<2x128xf32> to vector<2x32xf32>
    %398 = vector.extract_strided_slice %395 {offsets = [0, 64], sizes = [2, 32], strides = [1, 1]} : vector<2x128xf32> to vector<2x32xf32>
    %399 = vector.extract_strided_slice %394 {offsets = [0, 96], sizes = [2, 32], strides = [1, 1]} : vector<2x128xf32> to vector<2x32xf32>
    %400 = arith.mulf %397, %385 : vector<2x32xf32>
    %401 = arith.mulf %396, %398 : vector<2x32xf32>
    %402 = arith.addf %400, %401 : vector<2x32xf32>
    %403 = math.tanh %402 : vector<2x32xf32>
    %404 = arith.mulf %399, %403 : vector<2x32xf32>
    %cst_86 = arith.constant dense<0.000000e+00> : vector<2x128xf32>
    %405 = tpu.matmul %404, %281, %cst_86 {dimension_numbers = #tpu.dot_dimension_numbers<[1], [0], [0], [1], [0, 0, 1, 1], [], []>} : vector<2x32xf32>, vector<32x128xf32>, vector<2x128xf32> -> vector<2x128xf32>
    %406 = arith.addf %280, %405 : vector<2x128xf32>
    %407 = arith.negf %406 : vector<2x128xf32>
    %408 = math.exp %407 : vector<2x128xf32>
    %cst_87 = arith.constant 1.000000e+00 : f32
    %409 = vector.broadcast %cst_87 : f32 to vector<2x128xf32>
    %410 = arith.addf %409, %408 : vector<2x128xf32>
    %411 = arith.divf %409, %410 : vector<2x128xf32>
    %412 = math.tanh %406 : vector<2x128xf32>
    %413 = vector.extract_strided_slice %411 {offsets = [0, 0], sizes = [2, 32], strides = [1, 1]} : vector<2x128xf32> to vector<2x32xf32>
    %414 = vector.extract_strided_slice %411 {offsets = [0, 32], sizes = [2, 32], strides = [1, 1]} : vector<2x128xf32> to vector<2x32xf32>
    %415 = vector.extract_strided_slice %412 {offsets = [0, 64], sizes = [2, 32], strides = [1, 1]} : vector<2x128xf32> to vector<2x32xf32>
    %416 = vector.extract_strided_slice %411 {offsets = [0, 96], sizes = [2, 32], strides = [1, 1]} : vector<2x128xf32> to vector<2x32xf32>
    %417 = arith.mulf %414, %402 : vector<2x32xf32>
    %418 = arith.mulf %413, %415 : vector<2x32xf32>
    %419 = arith.addf %417, %418 : vector<2x32xf32>
    %420 = math.tanh %419 : vector<2x32xf32>
    %421 = arith.mulf %416, %420 : vector<2x32xf32>
    %422 = tpu.iota {dimensions = array<i32: 1>} : vector<2x32xi32>
    %c16_i32 = arith.constant 16 : i32
    %423 = vector.broadcast %c16_i32 : i32 to vector<2x32xi32>
    %424 = arith.cmpi slt, %422, %423 : vector<2x32xi32>
    %425 = arith.select %424, %421, %302 : vector<2x32xi1>, vector<2x32xf32>
    %c0_88 = arith.constant 0 : index
    %c0_89 = arith.constant 0 : index
    %426 = vector.load %arg10[%c0_88, %c0_89] : memref<32x3xf32, #tpu.memory_space<vmem>>, vector<32x3xf32>
    %cst_90 = arith.constant dense<0.000000e+00> : vector<2x3xf32>
    %427 = tpu.matmul %425, %426, %cst_90 {dimension_numbers = #tpu.dot_dimension_numbers<[1], [0], [0], [1], [0, 0, 1, 1], [], []>} : vector<2x32xf32>, vector<32x3xf32>, vector<2x3xf32> -> vector<2x3xf32>
    %c0_91 = arith.constant 0 : index
    %c0_92 = arith.constant 0 : index
    %428 = vector.load %arg11[%c0_91, %c0_92] : memref<1x3xf32, #tpu.memory_space<vmem>>, vector<1x3xf32>
    %429 = vector.broadcast %428 : vector<1x3xf32> to vector<2x3xf32>
    %430 = arith.addf %427, %429 : vector<2x3xf32>
    %c0_93 = arith.constant 0 : index
    %c0_94 = arith.constant 0 : index
    %431 = vector.load %arg12[%c0_93, %c0_94] : memref<2x3xf32, #tpu.memory_space<vmem>>, vector<2x3xf32>
    tpu.vector_store %arg12[%c0_93, %c0_94], %430 {strides = array<i32>} : memref<2x3xf32, #tpu.memory_space<vmem>>, vector<2x3xf32>,
    return
  }
  func.func @transform_0(%arg0: i32) -> (i32, i32, i32) {
    %c0_i32 = arith.constant 0 : i32
    %c0_i32_0 = arith.constant 0 : i32
    %c0_i32_1 = arith.constant 0 : i32
    %c0_i32_2 = arith.constant 0 : i32
    return %c0_i32, %c0_i32_0, %c0_i32_1 : i32, i32, i32
  }
  func.func @transform_1(%arg0: i32) -> (i32, i32) {
    %c0_i32 = arith.constant 0 : i32
    %c0_i32_0 = arith.constant 0 : i32
    %c0_i32_1 = arith.constant 0 : i32
    return %c0_i32, %c0_i32_0 : i32, i32
  }
  func.func @transform_2(%arg0: i32) -> (i32, i32) {
    %c0_i32 = arith.constant 0 : i32
    %c0_i32_0 = arith.constant 0 : i32
    %c0_i32_1 = arith.constant 0 : i32
    return %c0_i32, %c0_i32_0 : i32, i32
  }
  func.func @transform_3(%arg0: i32) -> (i32, i32) {
    %c0_i32 = arith.constant 0 : i32
    %c0_i32_0 = arith.constant 0 : i32
    %c0_i32_1 = arith.constant 0 : i32
    return %c0_i32, %c0_i32_0 : i32, i32
  }
  func.func @transform_4(%arg0: i32) -> (i32, i32) {
    %c0_i32 = arith.constant 0 : i32
    %c0_i32_0 = arith.constant 0 : i32
    %c0_i32_1 = arith.constant 0 : i32
    return %c0_i32, %c0_i32_0 : i32, i32
  }
  func.func @transform_5(%arg0: i32) -> (i32, i32) {
    %c0_i32 = arith.constant 0 : i32
    %c0_i32_0 = arith.constant 0 : i32
    %c0_i32_1 = arith.constant 0 : i32
    return %c0_i32, %c0_i32_0 : i32, i32
  }
  func.func @transform_6(%arg0: i32) -> (i32, i32) {
    %c0_i32 = arith.constant 0 : i32
    %c0_i32_0 = arith.constant 0 : i32
    %c0_i32_1 = arith.constant 0 : i32
    return %c0_i32, %c0_i32_0 : i32, i32
  }
  func.func @transform_7(%arg0: i32) -> (i32, i32, i32) {
    %c0_i32 = arith.constant 0 : i32
    %c0_i32_0 = arith.constant 0 : i32
    %c0_i32_1 = arith.constant 0 : i32
    %c0_i32_2 = arith.constant 0 : i32
    return %c0_i32, %c0_i32_0, %c0_i32_1 : i32, i32, i32
  }
  func.func @transform_8(%arg0: i32) -> (i32, i32, i32) {
    %c0_i32 = arith.constant 0 : i32
    %c0_i32_0 = arith.constant 0 : i32
    %c0_i32_1 = arith.constant 0 : i32
    %c0_i32_2 = arith.constant 0 : i32
    return %c0_i32, %c0_i32_0, %c0_i32_1 : i32, i32, i32
  }
  func.func @transform_9(%arg0: i32) -> (i32, i32) {
    %c0_i32 = arith.constant 0 : i32
    %c0_i32_0 = arith.constant 0 : i32
    %c0_i32_1 = arith.constant 0 : i32
    return %c0_i32, %c0_i32_0 : i32, i32
  }
  func.func @transform_10(%arg0: i32) -> (i32, i32) {
    %c0_i32 = arith.constant 0 : i32
    %c0_i32_0 = arith.constant 0 : i32
    %c0_i32_1 = arith.constant 0 : i32
    return %c0_i32, %c0_i32_0 : i32, i32
  }
  func.func @transform_11(%arg0: i32) -> (i32, i32) {
    %c0_i32 = arith.constant 0 : i32
    %c0_i32_0 = arith.constant 0 : i32
    %c0_i32_1 = arith.constant 0 : i32
    return %c0_i32, %c0_i32_0 : i32, i32
  }
}

</mosaic_0001>

<bundles_post_ra>
// kernel: roberta_cls_head_bilstm_forward.1
= control target key start
LH: loop header
LB: loop body
LE: loop exit
PB: predicated region body
PF: predicated region fallthrough
CT: control target
= control target key end

     0   :  { %16 = vsyncpa [#allocation4], 0  ;;  %s2864_s0 = inlined_call_operand.hbm [shape: f32[2,8,32], index: 0, kind: input, shape index: {}]   ;;  %s2865_s1 = inlined_call_operand.hbm [shape: f32[32,256], index: 1, kind: input, shape index: {}]   ;;  %s2866_s2 = inlined_call_operand.vmem [shape: f32[32,128], index: 2, kind: input, shape index: {}]   ;;  %s2867_s3 = inlined_call_operand.vmem [shape: f32[1,128], index: 3, kind: input, shape index: {}]   ;;  %s2868_s4 = inlined_call_operand.hbm [shape: f32[32,256], index: 4, kind: input, shape index: {}]   ;;  %s2869_s5 = inlined_call_operand.hbm [shape: f32[32,128], index: 5, kind: input, shape index: {}]   ;;  %s2870_s6 = inlined_call_operand.vmem [shape: f32[1,128], index: 6, kind: input, shape index: {}]   ;;  %s2871_s7 = inlined_call_operand.vmem [shape: f32[2,2,32], index: 7, kind: input, shape index: {}]   ;;  %s2872_s8 = inlined_call_operand.vmem [shape: f32[2,2,32], index: 8, kind: input, shape index: {}]   ;;  %s2873_s9 = inlined_call_operand.vmem [shape: f32[32,3], index: 9, kind: input, shape index: {}]   ;;  %s2874_s10 = inlined_call_operand.hbm [shape: f32[1,3], index: 10, kind: input, shape index: {}]   ;;  %s2875_s11 = inlined_call_operand.hbm [shape: f32[2,3], index: 11, kind: output, shape index: {}]  }
   0x1   :  { %17 = vsyncpa [#allocation7], 0 }
   0x2   :  { %18 = vsyncpa [#allocation10], 0  ;;  %s37_s19 = sshll.u32 %s2865_s1, 4  ;;  %s38_s19 = int_to_ptr.hbm [resolvable:$true] %s37_s19 }
   0x3   :  { %19 = vsyncpa [#allocation5], 0  ;;  %s2373_s20 = smov [#allocation6]   ;;  %s2374_s22 = smov 256  }
   0x4   :  { %s39_s21 = sshll.u32 %s2373_s20, 4  ;;  %s2375_s23 = smov 16   ;;  %s40_s21 = int_to_ptr.vmem [resolvable:$true] %s39_s21 }
   0x5   :  { %45 = dma.hbm_to_vmem [thread:$0]  %s38_s19, 1024, %s40_s21, [#allocation7], %s2374_s22, %s2374_s22, %s2375_s23  }
   0x6   :  { %s67_s26 = sshll.u32 %s2869_s5, 4  ;;  %s2376_s27 = smov [#allocation9]   ;;  %s68_s26 = int_to_ptr.hbm [resolvable:$true] %s67_s26 }
   0x7   :  { %s69_s28 = sshll.u32 %s2376_s27, 4  ;;  %s24_s12 = sshll.u32 %s2864_s0, 4  ;;  %s70_s28 = int_to_ptr.vmem [resolvable:$true] %s69_s28  ;;  %s25_s12 = int_to_ptr.hbm [resolvable:$true] %s24_s12 }
   0x8   :  { %s2377_s1 = smov 128   ;;  %s2378_s13 = smov 8  }
   0x9   :  { %75 = dma.hbm_to_vmem [thread:$0]  %s68_s26, 512, %s70_s28, [#allocation10], %s2377_s1, %s2377_s1, %s2378_s13  }
   0xa   :  { %s54_s16 = sshll.u32 %s2868_s4, 4  ;;  %s2379_s17 = smov [#allocation3]   ;;  %s55_s16 = int_to_ptr.hbm [resolvable:$true] %s54_s16 }
   0xb   :  { %s26_s18 = sshll.u32 %s2379_s17, 4  ;;  %s2380_s5 = smov [#allocation8]   ;;  %s27_s18 = int_to_ptr.vmem [resolvable:$true] %s26_s18 }
   0xc   :  { %32 = dma.hbm_to_vmem [thread:$0]  %s25_s12, 256, %s27_s18, [#allocation4], %s2377_s1, %s2377_s1, %s2378_s13  }
   0xd   :  { %s56_s19 = sshll.u32 %s2380_s5, 4  ;;  %s89_s0 = sshll.u32 %s2874_s10, 4  ;;  %s57_s19 = int_to_ptr.vmem [resolvable:$true] %s56_s19  ;;  %s90_s0 = int_to_ptr.hbm [resolvable:$true] %s89_s0 }
   0xe   :  { %62 = dma.hbm_to_vmem [thread:$0]  %s55_s16, 1024, %s57_s19, [#allocation7], %s2374_s22, %s2374_s22, %s2375_s23  }
   0xf   :  { %s2381_s24 = smov [#allocation11]  }
  0x10   :  { %s91_s25 = sshll.u32 %s2381_s24, 4  ;;  %s92_s25 = int_to_ptr.vmem [resolvable:$true] %s91_s25 }
  0x11   :  { %94 = dma.hbm_to_vmem [thread:$0]  %s90_s0, 16, %s92_s25, [#allocation10]  }
  0x12   :  { %2365 = dma.done.wait [#allocation4], 256  }
  0x13   :  { %2366 = vsyncadd [#allocation4], 4294967040 }
  0x14   :  { %2367 = dma.done.wait [#allocation7], 2048  }
  0x15   :  { %2368 = vsyncadd [#allocation7], 4294965248 }
  0x16   :  { %2369 = dma.done.wait [#allocation10], 528  }
  0x17   :  { %2370 = vsyncadd [#allocation10], 4294966768  ;;  %v134_v0 = vld [vmem:[#allocation6 + $0x38] sm:$0xff]  ;;  %v133_v1 = vld [vmem:[#allocation6 + $0x30] sm:$0xff]  ;;  %vm115_vm0 = vcmask 261120   ;;  %s2382_s30 = smov 32  }
  0x18   :  { %v132_v2 = vld [vmem:[#allocation6 + $0x28] sm:$0xff]  ;;  %176 = vmatpush.msra.mxu2 %v134_v0  ;;  %153 = vmatpush.msra.mxu3 %v133_v1  ;;  %v131_v3 = vld [vmem:[#allocation6 + $0x20] sm:$0xff]  ;;  %v130_v4 = vld [vmem:[#allocation6 + $0x18] sm:$0xff]  ;;  %vm344_vm9 = vcmask 1041409   ;;  %vm349_vm10 = vcmask 123904   ;;  %vm351_vm11 = vcmask 255104  }
  0x19   :  { %v129_v5 = vld [vmem:[#allocation6 + $0x10] sm:$0xff]  ;;  %v128_v6 = vld [vmem:[#allocation6 + $0x8] sm:$0xff]  ;;  %v127_v9 = vld [vmem:[#allocation6] sm:$0xff]  ;;  %s2385_s10 = smov [#allocation12]  }
  0x1a   :  { %177 = vmatpush.msra.mxu2 %v132_v2  ;;  %154 = vmatpush.msra.mxu3 %v131_v3  ;;  %v2464_v7 = vld [vmem:[%s2866_s2 + $0x18] sm:$0xff]  ;;  %v125_v8 = vld [vmem:[#allocation3] sm:$0xff]  ;;  %v2469_v10 = vld [vmem:[%s2866_s2 + $0x10] sm:$0xff]  ;;  %s1936_s22 = sshll.u32 %s2385_s10, 4  ;;  %s1937_s22 = int_to_ptr.vmem [resolvable:$true] %s1936_s22 }
  0x1b   :  { %743 = vmatpush.msra.mxu0 %v2464_v7  ;;  %869 = vmatpush.msra.mxu1 %v2464_v7  ;;  %v229_v11 = vld [vmem:[%s2872_s8] sm:$0x3]  ;;  %v2484_v13 = vld [vmem:[%s2866_s2 + $0x8] sm:$0xff] }
  0x1c   :  { %178 = vmatpush.msra.mxu2 %v130_v4  ;;  %155 = vmatpush.msra.mxu3 %v129_v5  ;;  %v300_v12 = vrot.slane %v229_v11, 1  ;;  %v2493_v14 = vld [vmem:[%s2866_s2] sm:$0xff]  ;;  %v126_v15 = vld [vmem:[#allocation3 + $0x8] sm:$0xff] }
  0x1d   :  { %744 = vmatpush.msra.mxu0 %v2469_v10  ;;  %870 = vmatpush.msra.mxu1 %v2469_v10  ;;  %v228_v16 = vld [vmem:[%s2871_s7] sm:$0x3] }
  0x1e   :  { %179 = vmatpush.msra.mxu2 %v128_v6  ;;  %156 = vmatpush.msra.mxu3 %v127_v9  ;;  %v2026_v22 = vld [vmem:[%s2867_s3] ss:$0 sm:$0xff]  ;;  %s2383_s3 = smov 64  }
  0x1f   :  { %1952 = vmatmul.msk.f32.vlgmr.msra.gmra.mxu2 %vm115_vm0, %v125_v8  ;;  %1950 = vmatmul.msk.f32.vlgmr.msra.gmra.mxu3 %vm115_vm0, %v125_v8 }
  0x20   :  { %245 = vmatpush.msrb.mxu2 %v2464_v7  ;;  %303 = vrot.lane.b32.xlu1 %v300_v12, %s2382_s30 }
  0x21   :  { %367 = vmatpush.msrb.mxu3 %v2464_v7  ;;  %745 = vmatpush.msra.mxu0 %v2484_v13 }
  0x22   :  { %246 = vmatpush.msrb.mxu2 %v2469_v10  ;;  %871 = vmatpush.msra.mxu1 %v2484_v13 }
  0x23   :  { %368 = vmatpush.msrb.mxu3 %v2469_v10  ;;  %746 = vmatpush.msra.mxu0 %v2493_v14 }
  0x24   :  { %247 = vmatpush.msrb.mxu2 %v2484_v13  ;;  %872 = vmatpush.msra.mxu1 %v2493_v14 }
  0x25   :  { %369 = vmatpush.msrb.mxu3 %v2484_v13 }
  0x26   :  { %248 = vmatpush.msrb.mxu2 %v2493_v14 }
  0x27   :  { %1953 = vmatmul.msk.f32.gmra.mxu2 %vm115_vm0, %v126_v15  ;;  %1951 = vmatmul.msk.f32.gmra.mxu3 %vm115_vm0, %v126_v15 }
  0x28   :  { %301 = vrot.lane.b32.xlu1 %v229_v11, %s2382_s30  ;;  %370 = vmatpush.msrb.mxu3 %v2493_v14 }
  0x29   :  { %491 = vmatpush.msra.mxu2 %v2464_v7 }
  0x2a   :  { %617 = vmatpush.msra.mxu3 %v2464_v7 }
  0x2b   :  { %492 = vmatpush.msra.mxu2 %v2469_v10 }
  0x2c   :  { %618 = vmatpush.msra.mxu3 %v2469_v10 }
  0x2d   :  { %493 = vmatpush.msra.mxu2 %v2484_v13 }
  0x2e   :  { %619 = vmatpush.msra.mxu3 %v2484_v13 }
  0x2f   :  { %1954 = vmatmul.msk.f32.vlgmr.msrb.gmra.mxu2 %vm115_vm0, %v228_v16 }
  0x30   :  { %620 = vmatpush.msra.mxu3 %v2493_v14  ;;  %494 = vmatpush.msra.mxu2 %v2493_v14 }
  0x32   :  { %995 = vmatpush.msrb.mxu2 %v2464_v7 }
  0x34   :  { %996 = vmatpush.msrb.mxu2 %v2469_v10 }
  0x36   :  { %997 = vmatpush.msrb.mxu2 %v2484_v13 }
  0x38   :  { %998 = vmatpush.msrb.mxu2 %v2493_v14 }
  0xa2   :  { %v181_v17 = vpop.f32.mrf.mxu2  ;;  %v158_v18 = vpop.f32.mrf.mxu3 }
  0xa3   :  { %v200_v19 = vrot.slane %v181_v17, 5  ;;  %v208_v20 = vrot.slane %v181_v17, 3  ;;  %v216_v21 = vrot.slane %v181_v17, 1  ;;  %v189_v42 = vrot.slane %v181_v17, 7 }
  0xa5   :  { %v204_v23 = vadd.f32 %v200_v19, %v158_v18  ;;  %v212_v24 = vadd.f32 %v208_v20, %v158_v18  ;;  %v220_v25 = vadd.f32 %v216_v21, %v158_v18  ;;  %v193_v47 = vadd.f32 %v189_v42, %v158_v18 }
  0xa7   :  { %v2525_v26 = vadd.f32 %v2026_v22, %v204_v23  ;;  %v2527_v27 = vadd.f32 %v2026_v22, %v212_v24  ;;  %v2529_v28 = vadd.f32 %v2026_v22, %v220_v25  ;;  %v2540_v48 = vadd.f32 %v2026_v22, %v193_v47 }
  0xaa   :  { %v184_v29 = vpop.f32.mrf.mxu2  ;;  %v161_v30 = vpop.f32.mrf.mxu3 }
  0xab   :  { %v190_v31 = vrot.slane %v184_v29, 7  ;;  %v201_v32 = vrot.slane %v184_v29, 5  ;;  %v209_v33 = vrot.slane %v184_v29, 3  ;;  %v217_v34 = vrot.slane %v184_v29, 1 }
  0xad   :  { %v213_v35 = vadd.f32 %v209_v33, %v161_v30  ;;  %v221_v36 = vadd.f32 %v217_v34, %v161_v30  ;;  %v205_v37 = vadd.f32 %v201_v32, %v161_v30  ;;  %v194_v38 = vadd.f32 %v190_v31, %v161_v30 }
  0xaf   :  { %v2531_v39 = vadd.f32 %v2026_v22, %v205_v37  ;;  %v2533_v40 = vadd.f32 %v2026_v22, %v213_v35  ;;  %v2535_v41 = vadd.f32 %v2026_v22, %v221_v36  ;;  %v2537_v44 = vadd.f32 %v2026_v22, %v194_v38  ;;  %v304_v22 = vpop.permute.xlu1 %303 }
  0xb0   :  { %v2384_v35 = vmov 0.0  }
  0xb1   :  { %116 = vst.msk [vmem:[#allocation2] sm:$0xff] %vm115_vm0, %v2384_v35 }
  0xb2   :  { %v250_v43 = vpop.f32.mrf.mxu2  ;;  %123 = vst.msk [vmem:[#allocation2 + $0x38] sm:$0xff] %vm115_vm0, %v2384_v35 }
  0xb3   :  { %v254_v45 = vrot.slane %v250_v43, 1  ;;  %v257_v49 = vadd.f32 %v250_v43, %v2540_v48  ;;  %117 = vst.msk [vmem:[#allocation2 + $0x8] sm:$0xff] %vm115_vm0, %v2384_v35 }
  0xb4   :  { %118 = vst.msk [vmem:[#allocation2 + $0x10] sm:$0xff] %vm115_vm0, %v2384_v35 }
  0xb5   :  { %v258_v46 = vadd.f32 %v254_v45, %v2537_v44  ;;  %v1955_v53 = vmul.f32 -1.442695, %v257_v49  ;;  %119 = vst.msk [vmem:[#allocation2 + $0x18] sm:$0xff] %vm115_vm0, %v2384_v35 }
  0xb6   :  { %120 = vst.msk [vmem:[#allocation2 + $0x20] sm:$0xff] %vm115_vm0, %v2384_v35 }
  0xb7   :  { %2029 = vtanh.f32 %v258_v46  ;;  %v1956_v52 = vmul.f32 -1.442695, %v258_v46  ;;  %v302_v29 = vpop.permute.xlu1 %301  ;;  %121 = vst.msk [vmem:[#allocation2 + $0x28] sm:$0xff] %vm115_vm0, %v2384_v35 }
  0xb8   :  { %2031 = vtanh.f32 %v257_v49  ;;  %122 = vst.msk [vmem:[#allocation2 + $0x30] sm:$0xff] %vm115_vm0, %v2384_v35 }
  0xb9   :  { %2033 = vpow2.f32 %v1956_v52 }
  0xba   :  { %2035 = vpow2.f32 %v1955_v53 }
  0xbd   :  { %v2030_v50 = vpop.eup %2029 }
  0xbe   :  { %313 = vrot.lane.b32.xlu0 %v2030_v50, %s2383_s3  ;;  %v2032_v51 = vpop.eup %2031 }
  0xbf   :  { %v2034_v54 = vpop.eup %2033 }
  0xc0   :  { %v266_v55 = vadd.f32 1.0, %v2034_v54  ;;  %v2036_v56 = vpop.eup %2035 }
  0xc1   :  { %v265_v57 = vadd.f32 1.0, %v2036_v56 }
  0xc2   :  { %2037 = vrcp.f32 %v266_v55  ;;  %v293_v2 = vand.u32 2147483648, %v266_v55  ;;  %vm287_vm2 = vweird.f32 %v266_v55  ;;  %v291_v3 = vand.u32 2147483647, %v266_v55 }
  0xc3   :  { %2039 = vrcp.f32 %v265_v57  ;;  %v278_v15 = vand.u32 2147483648, %v265_v57  ;;  %vm272_vm6 = vweird.f32 %v265_v57  ;;  %v276_v16 = vand.u32 2147483647, %v265_v57 }
  0xc4   :  { %v294_v6 = vor.u32 1.1754944e-38, %v293_v2  ;;  %vm292_vm4 = vcmp.eq.f32.partialorder %v291_v3, 8.507059e+37 }
  0xc5   :  { %v279_v18 = vor.u32 1.1754944e-38, %v278_v15  ;;  %vm277_vm8 = vcmp.eq.f32.partialorder %v276_v16, 8.507059e+37 }
  0xc6   :  { %311 = vrot.lane.b32.xlu0 %v2032_v51, %s2383_s3 }
  0xc8   :  { %v2038_v58 = vpop.eup %2037 }
  0xc9   :  { %v283_v59 = vmul.f32 %v2038_v58, %v266_v55  ;;  %v2040_v61 = vpop.eup %2039  ;;  %vm288_vm1 = vweird.f32 %v2038_v58 }
  0xca   :  { %v268_v63 = vmul.f32 %v2040_v61, %v265_v57  ;;  %vm289_vm3 = vmor %vm287_vm2, %vm288_vm1  ;;  %vm273_vm5 = vweird.f32 %v2040_v61 }
  0xcb   :  { %v284_v60 = vsub.f32 1.0, %v283_v59  ;;  %vm274_vm7 = vmor %vm272_vm6, %vm273_vm5  ;;  %vm464_vm5 = vcmask 1042434  }
  0xcc   :  { %v269_v1 = vsub.f32 1.0, %v268_v63 }
  0xcd   :  { %v285_v62 = vmul.f32 %v2038_v58, %v284_v60 }
  0xce   :  { %v270_v5 = vmul.f32 %v2040_v61, %v269_v1 }
  0xcf   :  { %v286_v0 = vadd.f32 %v2038_v58, %v285_v62 }
  0xd0   :  { %v271_v11 = vadd.f32 %v2040_v61, %v270_v5 }
  0xd1   :  { %v290_v4 = vsel %vm289_vm3, %v2038_v58, %v286_v0 }
  0xd2   :  { %v295_v8 = vsel %vm292_vm4, %v294_v6, %v290_v4  ;;  %v275_v17 = vsel %vm274_vm7, %v2040_v61, %v271_v11 }
  0xd3   :  { %v280_v19 = vsel %vm277_vm8, %v279_v18, %v275_v17  ;;  %v308_v23 = vmul.f32 %v304_v22, %v295_v8 }
  0xd4   :  { %v307_v30 = vmul.f32 %v302_v29, %v280_v19 }
 0x130   :  { %v314_v9 = vpop.permute.xlu0 %313 }
 0x131   :  { %v318_v12 = vmul.f32 %v314_v9, %v295_v8 }
 0x133   :  { %323 = vrot.lane.b32.xlu2 %v318_v12, %s2382_s30 }
 0x138   :  { %v312_v20 = vpop.permute.xlu0 %311 }
 0x139   :  { %v317_v21 = vmul.f32 %v312_v20, %v280_v19 }
 0x13b   :  { %321 = vrot.lane.b32.xlu2 %v317_v21, %s2382_s30 }
 0x18d   :  { %v324_v24 = vpop.permute.xlu2 %323 }
 0x18e   :  { %v2547_v25 = vadd.f32 %v324_v24, %v308_v23 }
 0x190   :  { %2041 = vtanh.f32 %v2547_v25  ;;  %v424_v29 = vrot.slane %v2547_v25, 7 }
 0x195   :  { %v322_v31 = vpop.permute.xlu2 %321 }
 0x196   :  { %v2042_v32 = vpop.eup %2041  ;;  %v2550_v33 = vadd.f32 %v322_v31, %v307_v30 }
 0x197   :  { %335 = vrot.lane.b32.xlu0 %v2042_v32, %s2383_s3 }
 0x198   :  { %2043 = vtanh.f32 %v2550_v33  ;;  %v423_v20 = vrot.slane %v2550_v33, 7 }
 0x19e   :  { %v2044_v34 = vpop.eup %2043 }
 0x19f   :  { %333 = vrot.lane.b32.xlu1 %v2044_v34, %s2383_s3 }
 0x209   :  { %v336_v36 = vpop.permute.xlu0 %335 }
 0x20a   :  { %v340_v37 = vmul.f32 %v336_v36, %v295_v8 }
 0x20c   :  { %v343_v42 = vrot.slane %v340_v37, 7 }
 0x211   :  { %v334_v38 = vpop.permute.xlu1 %333 }
 0x212   :  { %v339_v43 = vmul.f32 %v334_v38, %v280_v19 }
 0x214   :  { %v345_v45 = vsel %vm344_vm9, %v343_v42, %v339_v43 }
 0x215   :  { %346 = vrot.lane.b32.xlu2 %v345_v45, %s2382_s30 }
 0x26f   :  { %v347_v46 = vpop.permute.xlu2 %346 }
 0x270   :  { %350 = vst.msk [vmem:[#allocation2] sm:$0x3] %vm349_vm10, %v347_v46  ;;  %1957 = vmatmul.msk.f32.vlgmr.msrb.gmra.mxu3 %vm115_vm0, %v347_v46 }
 0x271   :  { %352 = vst.msk [vmem:[#allocation2 + $0x38] sm:$0x3] %vm351_vm11, %v347_v46  ;;  %1121 = vmatpush.msrb.mxu3 %v2464_v7 }
 0x273   :  { %1122 = vmatpush.msrb.mxu3 %v2469_v10 }
 0x275   :  { %1123 = vmatpush.msrb.mxu3 %v2484_v13 }
 0x277   :  { %1124 = vmatpush.msrb.mxu3 %v2493_v14 }
 0x2f3   :  { %v372_v47 = vpop.f32.mrf.mxu3 }
 0x2f4   :  { %v376_v49 = vrot.slane %v372_v47, 7  ;;  %v380_v50 = vadd.f32 %v372_v47, %v2531_v39 }
 0x2f6   :  { %v379_v51 = vadd.f32 %v376_v49, %v2525_v26  ;;  %2045 = vtanh.f32 %v380_v50  ;;  %v1959_v7 = vmul.f32 -1.442695, %v380_v50 }
 0x2f8   :  { %2047 = vtanh.f32 %v379_v51  ;;  %v1958_v10 = vmul.f32 -1.442695, %v379_v51 }
 0x2f9   :  { %2049 = vpow2.f32 %v1959_v7 }
 0x2fa   :  { %2051 = vpow2.f32 %v1958_v10 }
 0x2fc   :  { %v2046_v52 = vpop.eup %2045 }
 0x2fd   :  { %433 = vrot.lane.b32.xlu1 %v2046_v52, %s2383_s3 }
 0x2fe   :  { %v2048_v53 = vpop.eup %2047 }
 0x2ff   :  { %431 = vrot.lane.b32.xlu0 %v2048_v53, %s2383_s3  ;;  %v2050_v13 = vpop.eup %2049 }
 0x300   :  { %v2052_v14 = vpop.eup %2051  ;;  %v388_v54 = vadd.f32 1.0, %v2050_v13 }
 0x301   :  { %v387_v55 = vadd.f32 1.0, %v2052_v14 }
 0x302   :  { %2053 = vrcp.f32 %v388_v54  ;;  %v415_v1 = vand.u32 2147483648, %v388_v54  ;;  %vm409_vm13 = vweird.f32 %v388_v54  ;;  %v413_v2 = vand.u32 2147483647, %v388_v54 }
 0x303   :  { %2055 = vrcp.f32 %v387_v55  ;;  %v400_v5 = vand.u32 2147483648, %v387_v55  ;;  %vm394_vm1 = vweird.f32 %v387_v55  ;;  %v398_v8 = vand.u32 2147483647, %v387_v55 }
 0x304   :  { %v416_v6 = vor.u32 1.1754944e-38, %v415_v1  ;;  %vm414_vm2 = vcmp.eq.f32.partialorder %v413_v2, 8.507059e+37 }
 0x305   :  { %v401_v16 = vor.u32 1.1754944e-38, %v400_v5  ;;  %vm399_vm4 = vcmp.eq.f32.partialorder %v398_v8, 8.507059e+37 }
 0x308   :  { %v2054_v56 = vpop.eup %2053 }
 0x309   :  { %v2056_v57 = vpop.eup %2055  ;;  %v405_v58 = vmul.f32 %v2054_v56, %v388_v54  ;;  %vm410_vm12 = vweird.f32 %v2054_v56 }
 0x30a   :  { %v390_v59 = vmul.f32 %v2056_v57, %v387_v55  ;;  %vm411_vm14 = vmor %vm409_vm13, %vm410_vm12  ;;  %vm395_vm15 = vweird.f32 %v2056_v57 }
 0x30b   :  { %v406_v60 = vsub.f32 1.0, %v405_v58  ;;  %vm396_vm3 = vmor %vm394_vm1, %vm395_vm15  ;;  %vm589_vm15 = vcmask 1043459  }
 0x30c   :  { %v391_v61 = vsub.f32 1.0, %v390_v59 }
 0x30d   :  { %v407_v62 = vmul.f32 %v2054_v56, %v406_v60 }
 0x30e   :  { %v392_v63 = vmul.f32 %v2056_v57, %v391_v61 }
 0x30f   :  { %v408_v0 = vadd.f32 %v2054_v56, %v407_v62 }
 0x310   :  { %v393_v3 = vadd.f32 %v2056_v57, %v392_v63 }
 0x311   :  { %v412_v4 = vsel %vm411_vm14, %v2054_v56, %v408_v0 }
 0x312   :  { %v417_v11 = vsel %vm414_vm2, %v416_v6, %v412_v4  ;;  %v397_v12 = vsel %vm396_vm3, %v2056_v57, %v393_v3 }
 0x313   :  { %v402_v18 = vsel %vm399_vm4, %v401_v16, %v397_v12  ;;  %v428_v30 = vmul.f32 %v424_v29, %v417_v11 }
 0x314   :  { %v427_v21 = vmul.f32 %v423_v20, %v402_v18 }
 0x36f   :  { %v434_v9 = vpop.permute.xlu1 %433 }
 0x370   :  { %v438_v15 = vmul.f32 %v434_v9, %v417_v11 }
 0x371   :  { %v432_v17 = vpop.permute.xlu0 %431 }
 0x372   :  { %443 = vrot.lane.b32.xlu0 %v438_v15, %s2382_s30  ;;  %v437_v19 = vmul.f32 %v432_v17, %v402_v18 }
 0x374   :  { %441 = vrot.lane.b32.xlu2 %v437_v19, %s2382_s30 }
 0x3ce   :  { %v442_v22 = vpop.permute.xlu2 %441 }
 0x3cf   :  { %v2577_v23 = vadd.f32 %v442_v22, %v427_v21 }
 0x3d1   :  { %2057 = vtanh.f32 %v2577_v23 }
 0x3d7   :  { %v2058_v24 = vpop.eup %2057 }
 0x3d8   :  { %453 = vrot.lane.b32.xlu1 %v2058_v24, %s2383_s3 }
 0x3e4   :  { %v444_v31 = vpop.permute.xlu0 %443 }
 0x3e5   :  { %v2582_v32 = vadd.f32 %v444_v31, %v428_v30  ;;  %v548_v30 = vrot.slane %v2577_v23, 7 }
 0x3e7   :  { %2059 = vtanh.f32 %v2582_v32  ;;  %v549_v20 = vrot.slane %v2582_v32, 7 }
 0x3ed   :  { %v2060_v34 = vpop.eup %2059 }
 0x3ee   :  { %455 = vrot.lane.b32.xlu2 %v2060_v34, %s2383_s3 }
 0x448   :  { %v456_v33 = vpop.permute.xlu2 %455 }
 0x449   :  { %v460_v35 = vmul.f32 %v456_v33, %v417_v11 }
 0x44a   :  { %v454_v37 = vpop.permute.xlu1 %453 }
 0x44b   :  { %v463_v36 = vrot.slane %v460_v35, 7  ;;  %v459_v38 = vmul.f32 %v454_v37, %v402_v18 }
 0x44d   :  { %v473_v42 = vrot.slane %v459_v38, 1  ;;  %v2586_v43 = vsel %vm464_vm5, %v463_v36, %v459_v38 }
 0x44f   :  { %v474_v25 = vsel %vm344_vm9, %v460_v35, %v473_v42 }
 0x450   :  { %475 = vrot.lane.b32.xlu0 %v474_v25, %s2382_s30 }
 0x4c2   :  { %v476_v45 = vpop.permute.xlu0 %475 }
 0x4c3   :  { %1960 = vmatmul.msk.f32.vlgmr.msra.gmra.mxu2 %vm115_vm0, %v476_v45 }
 0x546   :  { %v496_v46 = vpop.f32.mrf.mxu2 }
 0x547   :  { %v500_v47 = vrot.slane %v496_v46, 6  ;;  %v501_v49 = vrot.slane %v496_v46, 7 }
 0x549   :  { %v504_v50 = vadd.f32 %v500_v47, %v2527_v27  ;;  %v505_v51 = vadd.f32 %v501_v49, %v2533_v40 }
 0x54b   :  { %2061 = vtanh.f32 %v504_v50  ;;  %v1962_v7 = vmul.f32 -1.442695, %v505_v51  ;;  %v1961_v54 = vmul.f32 -1.442695, %v504_v50 }
 0x54c   :  { %2063 = vtanh.f32 %v505_v51 }
 0x54d   :  { %2065 = vpow2.f32 %v1962_v7 }
 0x551   :  { %v2062_v52 = vpop.eup %2061 }
 0x552   :  { %v2064_v53 = vpop.eup %2063  ;;  %556 = vrot.lane.b32.xlu1 %v2062_v52, %s2383_s3 }
 0x553   :  { %558 = vrot.lane.b32.xlu2 %v2064_v53, %s2383_s3  ;;  %v2066_v10 = vpop.eup %2065 }
 0x554   :  { %v513_v13 = vadd.f32 1.0, %v2066_v10 }
 0x556   :  { %2067 = vrcp.f32 %v513_v13  ;;  %v540_v61 = vand.u32 2147483648, %v513_v13  ;;  %vm534_vm7 = vweird.f32 %v513_v13  ;;  %v538_v62 = vand.u32 2147483647, %v513_v13 }
 0x557   :  { %2069 = vpow2.f32 %v1961_v54 }
 0x558   :  { %v541_v0 = vor.u32 1.1754944e-38, %v540_v61  ;;  %vm539_vm10 = vcmp.eq.f32.partialorder %v538_v62, 8.507059e+37 }
 0x55c   :  { %v2068_v14 = vpop.eup %2067 }
 0x55d   :  { %v530_v55 = vmul.f32 %v2068_v14, %v513_v13  ;;  %v2070_v57 = vpop.eup %2069  ;;  %vm535_vm6 = vweird.f32 %v2068_v14 }
 0x55e   :  { %v512_v59 = vadd.f32 1.0, %v2070_v57  ;;  %vm536_vm8 = vmor %vm534_vm7, %vm535_vm6 }
 0x55f   :  { %v531_v56 = vsub.f32 1.0, %v530_v55 }
 0x560   :  { %2071 = vrcp.f32 %v512_v59  ;;  %v525_v11 = vand.u32 2147483648, %v512_v59  ;;  %vm519_vm12 = vweird.f32 %v512_v59  ;;  %v523_v12 = vand.u32 2147483647, %v512_v59 }
 0x561   :  { %v532_v58 = vmul.f32 %v2068_v14, %v531_v56 }
 0x562   :  { %v526_v16 = vor.u32 1.1754944e-38, %v525_v11  ;;  %vm524_vm14 = vcmp.eq.f32.partialorder %v523_v12, 8.507059e+37 }
 0x563   :  { %v533_v60 = vadd.f32 %v2068_v14, %v532_v58 }
 0x565   :  { %v537_v63 = vsel %vm536_vm8, %v2068_v14, %v533_v60 }
 0x566   :  { %v542_v2 = vsel %vm539_vm10, %v541_v0, %v537_v63  ;;  %v2072_v3 = vpop.eup %2071  ;;  %vm715_vm10 = vcmask 1044484  }
 0x567   :  { %v515_v5 = vmul.f32 %v2072_v3, %v512_v59  ;;  %vm520_vm11 = vweird.f32 %v2072_v3  ;;  %v553_v21 = vmul.f32 %v549_v20, %v542_v2 }
 0x568   :  { %vm521_vm13 = vmor %vm519_vm12, %vm520_vm11 }
 0x569   :  { %v516_v6 = vsub.f32 1.0, %v515_v5 }
 0x56b   :  { %v517_v8 = vmul.f32 %v2072_v3, %v516_v6 }
 0x56d   :  { %v518_v9 = vadd.f32 %v2072_v3, %v517_v8 }
 0x56f   :  { %v522_v15 = vsel %vm521_vm13, %v2072_v3, %v518_v9 }
 0x570   :  { %v527_v18 = vsel %vm524_vm14, %v526_v16, %v522_v15 }
 0x571   :  { %v552_v31 = vmul.f32 %v548_v30, %v527_v18 }
 0x5ad   :  { %v559_v1 = vpop.permute.xlu2 %558 }
 0x5ae   :  { %v563_v4 = vmul.f32 %v559_v1, %v542_v2 }
 0x5b0   :  { %568 = vrot.lane.b32.xlu1 %v563_v4, %s2382_s30 }
 0x5c4   :  { %v557_v17 = vpop.permute.xlu1 %556 }
 0x5c5   :  { %v562_v19 = vmul.f32 %v557_v17, %v527_v18 }
 0x5c7   :  { %566 = vrot.lane.b32.xlu0 %v562_v19, %s2382_s30 }
 0x622   :  { %v569_v22 = vpop.permute.xlu1 %568 }
 0x623   :  { %v2598_v24 = vadd.f32 %v569_v22, %v553_v21 }
 0x625   :  { %2073 = vtanh.f32 %v2598_v24 }
 0x62b   :  { %v2074_v29 = vpop.eup %2073 }
 0x62c   :  { %580 = vrot.lane.b32.xlu0 %v2074_v29, %s2383_s3  ;;  %v675_v29 = vrot.slane %v2598_v24, 7 }
 0x639   :  { %v567_v34 = vpop.permute.xlu0 %566 }
 0x63a   :  { %v2603_v33 = vadd.f32 %v567_v34, %v552_v31 }
 0x63c   :  { %2075 = vtanh.f32 %v2603_v33  ;;  %v674_v22 = vrot.slane %v2603_v33, 7 }
 0x642   :  { %v2076_v35 = vpop.eup %2075 }
 0x643   :  { %578 = vrot.lane.b32.xlu2 %v2076_v35, %s2383_s3 }
 0x69d   :  { %v579_v32 = vpop.permute.xlu2 %578 }
 0x69e   :  { %v581_v36 = vpop.permute.xlu0 %580  ;;  %v584_v37 = vmul.f32 %v579_v32, %v527_v18 }
 0x69f   :  { %v585_v38 = vmul.f32 %v581_v36, %v542_v2 }
 0x6a0   :  { %v598_v42 = vrot.slane %v584_v37, 2 }
 0x6a1   :  { %v588_v25 = vrot.slane %v585_v38, 7  ;;  %v599_v45 = vrot.slane %v585_v38, 1 }
 0x6a3   :  { %v600_v46 = vsel %vm344_vm9, %v599_v45, %v598_v42  ;;  %v2608_v23 = vsel %vm589_vm15, %v588_v25, %v584_v37 }
 0x6a4   :  { %601 = vrot.lane.b32.xlu1 %v600_v46, %s2382_s30 }
 0x716   :  { %v602_v47 = vpop.permute.xlu1 %601 }
 0x717   :  { %1963 = vmatmul.msk.f32.vlgmr.msra.gmra.mxu3 %vm115_vm0, %v602_v47 }
 0x79a   :  { %v622_v49 = vpop.f32.mrf.mxu3 }
 0x79b   :  { %v626_v50 = vrot.slane %v622_v49, 5  ;;  %v627_v51 = vrot.slane %v622_v49, 6 }
 0x79d   :  { %v630_v52 = vadd.f32 %v626_v50, %v2529_v28  ;;  %v631_v53 = vadd.f32 %v627_v51, %v2535_v41 }
 0x79f   :  { %2077 = vtanh.f32 %v630_v52  ;;  %v1964_v13 = vmul.f32 -1.442695, %v630_v52  ;;  %v1965_v56 = vmul.f32 -1.442695, %v631_v53 }
 0x7a0   :  { %2079 = vtanh.f32 %v631_v53 }
 0x7a1   :  { %2081 = vpow2.f32 %v1964_v13 }
 0x7a5   :  { %v2078_v7 = vpop.eup %2077 }
 0x7a6   :  { %v2080_v10 = vpop.eup %2079  ;;  %682 = vrot.lane.b32.xlu2 %v2078_v7, %s2383_s3 }
 0x7a7   :  { %684 = vrot.lane.b32.xlu0 %v2080_v10, %s2383_s3  ;;  %v2082_v14 = vpop.eup %2081 }
 0x7a8   :  { %v638_v54 = vadd.f32 1.0, %v2082_v14 }
 0x7aa   :  { %2083 = vrcp.f32 %v638_v54  ;;  %v651_v63 = vand.u32 2147483648, %v638_v54  ;;  %vm645_vm2 = vweird.f32 %v638_v54  ;;  %v649_v0 = vand.u32 2147483647, %v638_v54 }
 0x7ab   :  { %2085 = vpow2.f32 %v1965_v56 }
 0x7ac   :  { %v652_v2 = vor.u32 1.1754944e-38, %v651_v63  ;;  %vm650_vm4 = vcmp.eq.f32.partialorder %v649_v0, 8.507059e+37 }
 0x7b0   :  { %v2084_v55 = vpop.eup %2083 }
 0x7b1   :  { %v641_v57 = vmul.f32 %v2084_v55, %v638_v54  ;;  %v2086_v60 = vpop.eup %2085  ;;  %vm646_vm1 = vweird.f32 %v2084_v55 }
 0x7b2   :  { %v639_v61 = vadd.f32 1.0, %v2086_v60  ;;  %vm647_vm3 = vmor %vm645_vm2, %vm646_vm1 }
 0x7b3   :  { %v642_v58 = vsub.f32 1.0, %v641_v57 }
 0x7b4   :  { %2087 = vrcp.f32 %v639_v61  ;;  %v666_v15 = vand.u32 2147483648, %v639_v61  ;;  %vm660_vm6 = vweird.f32 %v639_v61  ;;  %v664_v16 = vand.u32 2147483647, %v639_v61 }
 0x7b5   :  { %v643_v59 = vmul.f32 %v2084_v55, %v642_v58 }
 0x7b6   :  { %v667_v18 = vor.u32 1.1754944e-38, %v666_v15  ;;  %vm665_vm8 = vcmp.eq.f32.partialorder %v664_v16, 8.507059e+37 }
 0x7b7   :  { %v644_v62 = vadd.f32 %v2084_v55, %v643_v59 }
 0x7b9   :  { %v648_v1 = vsel %vm647_vm3, %v2084_v55, %v644_v62 }
 0x7ba   :  { %v653_v4 = vsel %vm650_vm4, %v652_v2, %v648_v1  ;;  %v2088_v6 = vpop.eup %2087  ;;  %vm841_vm4 = vcmask 1045509  }
 0x7bb   :  { %v656_v8 = vmul.f32 %v2088_v6, %v639_v61  ;;  %vm661_vm5 = vweird.f32 %v2088_v6  ;;  %v678_v30 = vmul.f32 %v674_v22, %v653_v4 }
 0x7bc   :  { %vm662_vm7 = vmor %vm660_vm6, %vm661_vm5 }
 0x7bd   :  { %v657_v9 = vsub.f32 1.0, %v656_v8 }
 0x7bf   :  { %v658_v11 = vmul.f32 %v2088_v6, %v657_v9 }
 0x7c1   :  { %v659_v12 = vadd.f32 %v2088_v6, %v658_v11 }
 0x7c3   :  { %v663_v17 = vsel %vm662_vm7, %v2088_v6, %v659_v12 }
 0x7c4   :  { %v668_v20 = vsel %vm665_vm8, %v667_v18, %v663_v17 }
 0x7c5   :  { %v679_v31 = vmul.f32 %v675_v29, %v668_v20 }
 0x800   :  { %v683_v3 = vpop.permute.xlu2 %682 }
 0x801   :  { %v688_v5 = vmul.f32 %v683_v3, %v653_v4 }
 0x803   :  { %692 = vrot.lane.b32.xlu1 %v688_v5, %s2382_s30 }
 0x819   :  { %v685_v19 = vpop.permute.xlu0 %684 }
 0x81a   :  { %v689_v21 = vmul.f32 %v685_v19, %v668_v20 }
 0x81c   :  { %694 = vrot.lane.b32.xlu2 %v689_v21, %s2382_s30 }
 0x875   :  { %v693_v34 = vpop.permute.xlu1 %692 }
 0x876   :  { %v695_v35 = vpop.permute.xlu2 %694  ;;  %v2620_v32 = vadd.f32 %v693_v34, %v678_v30 }
 0x877   :  { %v2622_v36 = vadd.f32 %v695_v35, %v679_v31 }
 0x878   :  { %2089 = vtanh.f32 %v2620_v32  ;;  %v800_v29 = vrot.slane %v2620_v32, 7 }
 0x879   :  { %2091 = vtanh.f32 %v2622_v36 }
 0x87e   :  { %v2090_v37 = vpop.eup %2089 }
 0x87f   :  { %v2092_v38 = vpop.eup %2091  ;;  %704 = vrot.lane.b32.xlu0 %v2090_v37, %s2383_s3  ;;  %v801_v37 = vrot.slane %v2622_v36, 7 }
 0x880   :  { %706 = vrot.lane.b32.xlu1 %v2092_v38, %s2383_s3 }
 0x8f1   :  { %v705_v33 = vpop.permute.xlu0 %704 }
 0x8f2   :  { %v707_v24 = vpop.permute.xlu1 %706  ;;  %v710_v42 = vmul.f32 %v705_v33, %v653_v4 }
 0x8f3   :  { %v711_v25 = vmul.f32 %v707_v24, %v668_v20 }
 0x8f4   :  { %v724_v45 = vrot.slane %v710_v42, 3 }
 0x8f5   :  { %v714_v46 = vrot.slane %v711_v25, 7  ;;  %v725_v47 = vrot.slane %v711_v25, 2 }
 0x8f7   :  { %v726_v49 = vsel %vm344_vm9, %v725_v47, %v724_v45  ;;  %v2629_v50 = vsel %vm715_vm10, %v714_v46, %v710_v42 }
 0x8f8   :  { %727 = vrot.lane.b32.xlu2 %v726_v49, %s2382_s30 }
 0x952   :  { %v728_v51 = vpop.permute.xlu2 %727 }
 0x953   :  { %1966 = vmatmul.msk.f32.vlgmr.msra.gmra.mxu0 %vm115_vm0, %v728_v51 }
 0x9d0   :  { %v748_v52 = vpop.f32.mrf.mxu0 }
 0x9d1   :  { %v752_v53 = vrot.slane %v748_v52, 4  ;;  %v753_v7 = vrot.slane %v748_v52, 5 }
 0x9d3   :  { %v756_v10 = vadd.f32 %v752_v53, %v2540_v48  ;;  %v757_v13 = vadd.f32 %v753_v7, %v2537_v44 }
 0x9d5   :  { %2093 = vtanh.f32 %v756_v10  ;;  %v1967_v55 = vmul.f32 -1.442695, %v756_v10  ;;  %v1968_v56 = vmul.f32 -1.442695, %v757_v13 }
 0x9d6   :  { %2095 = vtanh.f32 %v757_v13 }
 0x9d7   :  { %2097 = vpow2.f32 %v1967_v55 }
 0x9d8   :  { %2099 = vpow2.f32 %v1968_v56 }
 0x9db   :  { %v2094_v14 = vpop.eup %2093 }
 0x9dc   :  { %v2096_v54 = vpop.eup %2095  ;;  %808 = vrot.lane.b32.xlu0 %v2094_v14, %s2383_s3 }
 0x9dd   :  { %810 = vrot.lane.b32.xlu1 %v2096_v54, %s2383_s3  ;;  %v2098_v57 = vpop.eup %2097 }
 0x9de   :  { %v2100_v58 = vpop.eup %2099  ;;  %v764_v59 = vadd.f32 1.0, %v2098_v57 }
 0x9df   :  { %v765_v60 = vadd.f32 1.0, %v2100_v58 }
 0x9e0   :  { %2101 = vrcp.f32 %v764_v59  ;;  %v777_v5 = vand.u32 2147483648, %v764_v59  ;;  %vm771_vm13 = vweird.f32 %v764_v59  ;;  %v775_v8 = vand.u32 2147483647, %v764_v59 }
 0x9e1   :  { %2103 = vrcp.f32 %v765_v60  ;;  %v792_v6 = vand.u32 2147483648, %v765_v60  ;;  %vm786_vm14 = vweird.f32 %v765_v60  ;;  %v790_v9 = vand.u32 2147483647, %v765_v60 }
 0x9e2   :  { %v778_v15 = vor.u32 1.1754944e-38, %v777_v5  ;;  %vm776_vm2 = vcmp.eq.f32.partialorder %v775_v8, 8.507059e+37 }
 0x9e3   :  { %v793_v16 = vor.u32 1.1754944e-38, %v792_v6  ;;  %vm791_vm3 = vcmp.eq.f32.partialorder %v790_v9, 8.507059e+37 }
 0x9e6   :  { %v2102_v48 = vpop.eup %2101 }
 0x9e7   :  { %v2104_v44 = vpop.eup %2103  ;;  %v767_v61 = vmul.f32 %v2102_v48, %v764_v59  ;;  %vm772_vm11 = vweird.f32 %v2102_v48 }
 0x9e8   :  { %v782_v62 = vmul.f32 %v2104_v44, %v765_v60  ;;  %vm787_vm12 = vweird.f32 %v2104_v44  ;;  %vm773_vm15 = vmor %vm771_vm13, %vm772_vm11 }
 0x9e9   :  { %v768_v63 = vsub.f32 1.0, %v767_v61  ;;  %vm788_vm1 = vmor %vm786_vm14, %vm787_vm12  ;;  %vm967_vm14 = vcmask 1046534  }
 0x9ea   :  { %v783_v0 = vsub.f32 1.0, %v782_v62 }
 0x9eb   :  { %v769_v1 = vmul.f32 %v2102_v48, %v768_v63 }
 0x9ec   :  { %v784_v2 = vmul.f32 %v2104_v44, %v783_v0 }
 0x9ed   :  { %v770_v3 = vadd.f32 %v2102_v48, %v769_v1 }
 0x9ee   :  { %v785_v4 = vadd.f32 %v2104_v44, %v784_v2 }
 0x9ef   :  { %v774_v11 = vsel %vm773_vm15, %v2102_v48, %v770_v3 }
 0x9f0   :  { %v789_v12 = vsel %vm788_vm1, %v2104_v44, %v785_v4  ;;  %v779_v18 = vsel %vm776_vm2, %v778_v15, %v774_v11 }
 0x9f1   :  { %v794_v20 = vsel %vm791_vm3, %v793_v16, %v789_v12  ;;  %v804_v30 = vmul.f32 %v800_v29, %v779_v18 }
 0x9f2   :  { %v805_v38 = vmul.f32 %v801_v37, %v794_v20 }
 0xa4e   :  { %v809_v17 = vpop.permute.xlu0 %808 }
 0xa4f   :  { %v811_v19 = vpop.permute.xlu1 %810  ;;  %v814_v21 = vmul.f32 %v809_v17, %v779_v18 }
 0xa50   :  { %v815_v22 = vmul.f32 %v811_v19, %v794_v20 }
 0xa51   :  { %818 = vrot.lane.b32.xlu2 %v814_v21, %s2382_s30 }
 0xa52   :  { %820 = vrot.lane.b32.xlu0 %v815_v22, %s2382_s30 }
 0xaab   :  { %v819_v31 = vpop.permute.xlu2 %818 }
 0xaac   :  { %v2640_v34 = vadd.f32 %v819_v31, %v804_v30 }
 0xaae   :  { %2105 = vtanh.f32 %v2640_v34 }
 0xab4   :  { %v2106_v35 = vpop.eup %2105 }
 0xab5   :  { %830 = vrot.lane.b32.xlu1 %v2106_v35, %s2383_s3 }
 0xac4   :  { %v821_v33 = vpop.permute.xlu0 %820 }
 0xac5   :  { %v2645_v24 = vadd.f32 %v821_v33, %v805_v38  ;;  %v926_v38 = vrot.slane %v2640_v34, 7 }
 0xac7   :  { %2107 = vtanh.f32 %v2645_v24  ;;  %v927_v29 = vrot.slane %v2645_v24, 7 }
 0xacd   :  { %v2108_v42 = vpop.eup %2107 }
 0xace   :  { %832 = vrot.lane.b32.xlu2 %v2108_v42, %s2383_s3 }
 0xb27   :  { %v831_v32 = vpop.permute.xlu1 %830 }
 0xb28   :  { %v833_v25 = vpop.permute.xlu2 %832  ;;  %v836_v45 = vmul.f32 %v831_v32, %v779_v18 }
 0xb29   :  { %v837_v46 = vmul.f32 %v833_v25, %v794_v20 }
 0xb2a   :  { %v850_v47 = vrot.slane %v836_v45, 4 }
 0xb2b   :  { %v840_v49 = vrot.slane %v837_v46, 7  ;;  %v851_v51 = vrot.slane %v837_v46, 3 }
 0xb2d   :  { %v852_v52 = vsel %vm344_vm9, %v851_v51, %v850_v47  ;;  %v2650_v36 = vsel %vm841_vm4, %v840_v49, %v836_v45 }
 0xb2e   :  { %853 = vrot.lane.b32.xlu0 %v852_v52, %s2382_s30 }
 0xba0   :  { %v854_v53 = vpop.permute.xlu0 %853 }
 0xba1   :  { %1969 = vmatmul.msk.f32.vlgmr.msra.gmra.mxu1 %vm115_vm0, %v854_v53 }
 0xc1e   :  { %v874_v7 = vpop.f32.mrf.mxu1 }
 0xc1f   :  { %v878_v10 = vrot.slane %v874_v7, 3  ;;  %v879_v13 = vrot.slane %v874_v7, 4 }
 0xc21   :  { %v882_v14 = vadd.f32 %v878_v10, %v2525_v26  ;;  %v883_v54 = vadd.f32 %v879_v13, %v2531_v39 }
 0xc23   :  { %2109 = vtanh.f32 %v882_v14  ;;  %v1971_v57 = vmul.f32 -1.442695, %v883_v54  ;;  %v1970_v48 = vmul.f32 -1.442695, %v882_v14 }
 0xc24   :  { %2111 = vtanh.f32 %v883_v54 }
 0xc25   :  { %2113 = vpow2.f32 %v1971_v57 }
 0xc29   :  { %v2110_v55 = vpop.eup %2109 }
 0xc2a   :  { %v2112_v56 = vpop.eup %2111  ;;  %934 = vrot.lane.b32.xlu1 %v2110_v55, %s2383_s3 }
 0xc2b   :  { %936 = vrot.lane.b32.xlu2 %v2112_v56, %s2383_s3  ;;  %v2114_v58 = vpop.eup %2113 }
 0xc2c   :  { %v891_v59 = vadd.f32 1.0, %v2114_v58 }
 0xc2e   :  { %2115 = vrcp.f32 %v891_v59  ;;  %v918_v0 = vand.u32 2147483648, %v891_v59  ;;  %vm912_vm6 = vweird.f32 %v891_v59  ;;  %v916_v1 = vand.u32 2147483647, %v891_v59 }
 0xc2f   :  { %2117 = vpow2.f32 %v1970_v48 }
 0xc30   :  { %v919_v3 = vor.u32 1.1754944e-38, %v918_v0  ;;  %vm917_vm8 = vcmp.eq.f32.partialorder %v916_v1, 8.507059e+37 }
 0xc34   :  { %v2116_v60 = vpop.eup %2115 }
 0xc35   :  { %v908_v44 = vmul.f32 %v2116_v60, %v891_v59  ;;  %v2118_v61 = vpop.eup %2117  ;;  %vm913_vm5 = vweird.f32 %v2116_v60 }
 0xc36   :  { %v890_v62 = vadd.f32 1.0, %v2118_v61  ;;  %vm914_vm7 = vmor %vm912_vm6, %vm913_vm5 }
 0xc37   :  { %v909_v26 = vsub.f32 1.0, %v908_v44 }
 0xc38   :  { %2119 = vrcp.f32 %v890_v62  ;;  %v903_v16 = vand.u32 2147483648, %v890_v62  ;;  %vm897_vm11 = vweird.f32 %v890_v62  ;;  %v901_v17 = vand.u32 2147483647, %v890_v62 }
 0xc39   :  { %v910_v39 = vmul.f32 %v2116_v60, %v909_v26 }
 0xc3a   :  { %v904_v19 = vor.u32 1.1754944e-38, %v903_v16  ;;  %vm902_vm13 = vcmp.eq.f32.partialorder %v901_v17, 8.507059e+37 }
 0xc3b   :  { %v911_v63 = vadd.f32 %v2116_v60, %v910_v39 }
 0xc3d   :  { %v915_v2 = vsel %vm914_vm7, %v2116_v60, %v911_v63 }
 0xc3e   :  { %v920_v5 = vsel %vm917_vm8, %v919_v3, %v915_v2  ;;  %v2120_v6 = vpop.eup %2119  ;;  %vm1093_vm8 = vcmask 1047559  }
 0xc3f   :  { %v893_v9 = vmul.f32 %v2120_v6, %v890_v62  ;;  %vm898_vm10 = vweird.f32 %v2120_v6  ;;  %v931_v30 = vmul.f32 %v927_v29, %v920_v5 }
 0xc40   :  { %vm899_vm12 = vmor %vm897_vm11, %vm898_vm10 }
 0xc41   :  { %v894_v11 = vsub.f32 1.0, %v893_v9 }
 0xc43   :  { %v895_v12 = vmul.f32 %v2120_v6, %v894_v11 }
 0xc45   :  { %v896_v15 = vadd.f32 %v2120_v6, %v895_v12 }
 0xc47   :  { %v900_v18 = vsel %vm899_vm12, %v2120_v6, %v896_v15 }
 0xc48   :  { %v905_v21 = vsel %vm902_vm13, %v904_v19, %v900_v18 }
 0xc49   :  { %v930_v33 = vmul.f32 %v926_v38, %v905_v21 }
 0xc85   :  { %v937_v4 = vpop.permute.xlu2 %936 }
 0xc86   :  { %v941_v8 = vmul.f32 %v937_v4, %v920_v5 }
 0xc88   :  { %946 = vrot.lane.b32.xlu1 %v941_v8, %s2382_s30 }
 0xc9c   :  { %v935_v20 = vpop.permute.xlu1 %934 }
 0xc9d   :  { %v940_v22 = vmul.f32 %v935_v20, %v905_v21 }
 0xc9f   :  { %944 = vrot.lane.b32.xlu0 %v940_v22, %s2382_s30 }
 0xcfa   :  { %v947_v31 = vpop.permute.xlu1 %946 }
 0xcfb   :  { %v2661_v35 = vadd.f32 %v947_v31, %v931_v30 }
 0xcfd   :  { %2121 = vtanh.f32 %v2661_v35  ;;  %v1053_v29 = vrot.slane %v2661_v35, 7 }
 0xd03   :  { %v2122_v37 = vpop.eup %2121 }
 0xd04   :  { %958 = vrot.lane.b32.xlu0 %v2122_v37, %s2383_s3 }
 0xd11   :  { %v945_v42 = vpop.permute.xlu0 %944 }
 0xd12   :  { %v2666_v32 = vadd.f32 %v945_v42, %v930_v33 }
 0xd14   :  { %2123 = vtanh.f32 %v2666_v32  ;;  %v1052_v22 = vrot.slane %v2666_v32, 7 }
 0xd1a   :  { %v2124_v25 = vpop.eup %2123 }
 0xd1b   :  { %956 = vrot.lane.b32.xlu2 %v2124_v25, %s2383_s3 }
 0xd75   :  { %v957_v24 = vpop.permute.xlu2 %956 }
 0xd76   :  { %v959_v45 = vpop.permute.xlu0 %958  ;;  %v962_v46 = vmul.f32 %v957_v24, %v905_v21 }
 0xd77   :  { %v963_v47 = vmul.f32 %v959_v45, %v920_v5 }
 0xd78   :  { %v976_v49 = vrot.slane %v962_v46, 5 }
 0xd79   :  { %v966_v51 = vrot.slane %v963_v47, 7  ;;  %v977_v52 = vrot.slane %v963_v47, 4 }
 0xd7b   :  { %v978_v53 = vsel %vm344_vm9, %v977_v52, %v976_v49  ;;  %v2671_v34 = vsel %vm967_vm14, %v966_v51, %v962_v46 }
 0xd7c   :  { %979 = vrot.lane.b32.xlu1 %v978_v53, %s2382_s30 }
 0xdee   :  { %v980_v7 = vpop.permute.xlu1 %979 }
 0xdef   :  { %1972 = vmatmul.msk.f32.vlgmr.msrb.gmra.mxu2 %vm115_vm0, %v980_v7 }
 0xe72   :  { %v1000_v10 = vpop.f32.mrf.mxu2 }
 0xe73   :  { %v1004_v13 = vrot.slane %v1000_v10, 2  ;;  %v1005_v14 = vrot.slane %v1000_v10, 3 }
 0xe75   :  { %v1008_v54 = vadd.f32 %v1004_v13, %v2527_v27  ;;  %v1009_v55 = vadd.f32 %v1005_v14, %v2533_v40 }
 0xe77   :  { %2125 = vtanh.f32 %v1008_v54  ;;  %v1973_v58 = vmul.f32 -1.442695, %v1008_v54  ;;  %v1974_v44 = vmul.f32 -1.442695, %v1009_v55 }
 0xe78   :  { %2127 = vtanh.f32 %v1009_v55 }
 0xe79   :  { %2129 = vpow2.f32 %v1973_v58 }
 0xe7d   :  { %v2126_v56 = vpop.eup %2125 }
 0xe7e   :  { %v2128_v57 = vpop.eup %2127  ;;  %1060 = vrot.lane.b32.xlu2 %v2126_v56, %s2383_s3 }
 0xe7f   :  { %1062 = vrot.lane.b32.xlu0 %v2128_v57, %s2383_s3  ;;  %v2130_v59 = vpop.eup %2129 }
 0xe80   :  { %v1016_v60 = vadd.f32 1.0, %v2130_v59 }
 0xe82   :  { %2131 = vrcp.f32 %v1016_v60  ;;  %v1029_v63 = vand.u32 2147483648, %v1016_v60  ;;  %vm1023_vm1 = vweird.f32 %v1016_v60  ;;  %v1027_v0 = vand.u32 2147483647, %v1016_v60 }
 0xe83   :  { %2133 = vpow2.f32 %v1974_v44 }
 0xe84   :  { %v1030_v2 = vor.u32 1.1754944e-38, %v1029_v63  ;;  %vm1028_vm3 = vcmp.eq.f32.partialorder %v1027_v0, 8.507059e+37 }
 0xe88   :  { %v2132_v48 = vpop.eup %2131 }
 0xe89   :  { %v1019_v26 = vmul.f32 %v2132_v48, %v1016_v60  ;;  %v2134_v40 = vpop.eup %2133  ;;  %vm1024_vm15 = vweird.f32 %v2132_v48 }
 0xe8a   :  { %v1017_v39 = vadd.f32 1.0, %v2134_v40  ;;  %vm1025_vm2 = vmor %vm1023_vm1, %vm1024_vm15 }
 0xe8b   :  { %v1020_v27 = vsub.f32 1.0, %v1019_v26 }
 0xe8c   :  { %2135 = vrcp.f32 %v1017_v39  ;;  %v1044_v15 = vand.u32 2147483648, %v1017_v39  ;;  %vm1038_vm5 = vweird.f32 %v1017_v39  ;;  %v1042_v16 = vand.u32 2147483647, %v1017_v39 }
 0xe8d   :  { %v1021_v61 = vmul.f32 %v2132_v48, %v1020_v27 }
 0xe8e   :  { %v1045_v18 = vor.u32 1.1754944e-38, %v1044_v15  ;;  %vm1043_vm7 = vcmp.eq.f32.partialorder %v1042_v16, 8.507059e+37 }
 0xe8f   :  { %v1022_v62 = vadd.f32 %v2132_v48, %v1021_v61 }
 0xe91   :  { %v1026_v1 = vsel %vm1025_vm2, %v2132_v48, %v1022_v62  ;;  %vm469_vm2 = vcmask 124929  }
 0xe92   :  { %v1031_v4 = vsel %vm1028_vm3, %v1030_v2, %v1026_v1  ;;  %v2136_v6 = vpop.eup %2135  ;;  %vm471_vm3 = vcmask 256129  }
 0xe93   :  { %v1034_v8 = vmul.f32 %v2136_v6, %v1017_v39  ;;  %vm1039_vm4 = vweird.f32 %v2136_v6  ;;  %v1056_v30 = vmul.f32 %v1052_v22, %v1031_v4 }
 0xe94   :  { %vm1040_vm6 = vmor %vm1038_vm5, %vm1039_vm4  ;;  %vm1225_vm4 = vcmask 130055   ;;  %vm1229_vm5 = vcmask 261255  }
 0xe95   :  { %v1035_v9 = vsub.f32 1.0, %v1034_v8 }
 0xe97   :  { %v1036_v11 = vmul.f32 %v2136_v6, %v1035_v9 }
 0xe99   :  { %v1037_v12 = vadd.f32 %v2136_v6, %v1036_v11 }
 0xe9b   :  { %v1041_v17 = vsel %vm1040_vm6, %v2136_v6, %v1037_v12  ;;  %vm1227_vm6 = vcmask 122880  }
 0xe9c   :  { %v1046_v20 = vsel %vm1043_vm7, %v1045_v18, %v1041_v17  ;;  %vm1231_vm7 = vcmask 254080  }
 0xe9d   :  { %v1057_v31 = vmul.f32 %v1053_v29, %v1046_v20 }
 0xed8   :  { %v1061_v3 = vpop.permute.xlu2 %1060 }
 0xed9   :  { %v1066_v5 = vmul.f32 %v1061_v3, %v1031_v4 }
 0xedb   :  { %1070 = vrot.lane.b32.xlu1 %v1066_v5, %s2382_s30 }
 0xef1   :  { %v1063_v19 = vpop.permute.xlu0 %1062 }
 0xef2   :  { %v1067_v21 = vmul.f32 %v1063_v19, %v1046_v20 }
 0xef4   :  { %1072 = vrot.lane.b32.xlu2 %v1067_v21, %s2382_s30 }
 0xf4d   :  { %v1071_v37 = vpop.permute.xlu1 %1070 }
 0xf4e   :  { %v1073_v38 = vpop.permute.xlu2 %1072  ;;  %v2683_v33 = vadd.f32 %v1071_v37, %v1056_v30 }
 0xf4f   :  { %v2685_v42 = vadd.f32 %v1073_v38, %v1057_v31 }
 0xf50   :  { %2137 = vtanh.f32 %v2683_v33  ;;  %v1178_v31 = vrot.slane %v2683_v33, 7 }
 0xf51   :  { %2139 = vtanh.f32 %v2685_v42 }
 0xf56   :  { %v2138_v25 = vpop.eup %2137 }
 0xf57   :  { %v2140_v24 = vpop.eup %2139  ;;  %1082 = vrot.lane.b32.xlu0 %v2138_v25, %s2383_s3 }
 0xf58   :  { %1084 = vrot.lane.b32.xlu1 %v2140_v24, %s2383_s3 }
 0xfc9   :  { %v1083_v32 = vpop.permute.xlu0 %1082 }
 0xfca   :  { %v1085_v35 = vpop.permute.xlu1 %1084  ;;  %v1088_v45 = vmul.f32 %v1083_v32, %v1031_v4 }
 0xfcb   :  { %v1089_v46 = vmul.f32 %v1085_v35, %v1046_v20  ;;  %v1179_v20 = vrot.slane %v2685_v42, 7 }
 0xfcc   :  { %v1102_v47 = vrot.slane %v1088_v45, 6 }
 0xfcd   :  { %v1092_v49 = vrot.slane %v1089_v46, 7  ;;  %v1103_v51 = vrot.slane %v1089_v46, 5 }
 0xfcf   :  { %v1104_v52 = vsel %vm344_vm9, %v1103_v51, %v1102_v47  ;;  %v2692_v53 = vsel %vm1093_vm8, %v1092_v49, %v1088_v45  ;;  %v1247_v47 = vld [vmem:[#allocation8 + $0x28] sm:$0xff]  ;;  %v1246_v49 = vld [vmem:[#allocation8 + $0x20] sm:$0xff]  ;;  %v1245_v51 = vld [vmem:[#allocation8 + $0x18] sm:$0xff]  ;;  %vm1098_vm8 = vcmask 130054  }
 0xfd0   :  { %1105 = vrot.lane.b32.xlu2 %v1104_v52, %s2382_s30  ;;  %v1244_v52 = vld [vmem:[#allocation8 + $0x10] sm:$0xff] }
0x102a   :  { %v1106_v7 = vpop.permute.xlu2 %1105 }
0x102b   :  { %1975 = vmatmul.msk.f32.vlgmr.msrb.gmra.mxu3 %vm115_vm0, %v1106_v7 }
0x10ae   :  { %v1126_v10 = vpop.f32.mrf.mxu3 }
0x10af   :  { %v1130_v13 = vrot.slane %v1126_v10, 1  ;;  %v1131_v14 = vrot.slane %v1126_v10, 2 }
0x10b1   :  { %v1134_v54 = vadd.f32 %v1130_v13, %v2529_v28  ;;  %v1135_v55 = vadd.f32 %v1131_v14, %v2535_v41 }
0x10b3   :  { %2141 = vtanh.f32 %v1134_v54  ;;  %v1976_v58 = vmul.f32 -1.442695, %v1134_v54  ;;  %v1977_v59 = vmul.f32 -1.442695, %v1135_v55 }
0x10b4   :  { %2143 = vtanh.f32 %v1135_v55 }
0x10b5   :  { %2145 = vpow2.f32 %v1976_v58 }
0x10b6   :  { %2147 = vpow2.f32 %v1977_v59  ;;  %v2730_v59 = vld [vmem:[#allocation9 + $0x10] sm:$0xff] }
0x10b9   :  { %v2142_v56 = vpop.eup %2141 }
0x10ba   :  { %v2144_v57 = vpop.eup %2143  ;;  %1186 = vrot.lane.b32.xlu1 %v2142_v56, %s2383_s3 }
0x10bb   :  { %1188 = vrot.lane.b32.xlu0 %v2144_v57, %s2383_s3  ;;  %v2146_v60 = vpop.eup %2145  ;;  %v2724_v57 = vld [vmem:[#allocation9 + $0x18] sm:$0xff] }
0x10bc   :  { %v2148_v48 = vpop.eup %2147  ;;  %v1142_v44 = vadd.f32 1.0, %v2146_v60  ;;  %1398 = vmatpush.msra.mxu2 %v2724_v57  ;;  %1465 = vmatpush.msra.mxu3 %v2724_v57  ;;  %v2732_v60 = vld [vmem:[#allocation9 + $0x8] sm:$0xff] }
0x10bd   :  { %v1143_v26 = vadd.f32 1.0, %v2148_v48  ;;  %v2736_v48 = vld [vmem:[#allocation9] sm:$0xff] }
0x10be   :  { %2149 = vrcp.f32 %v1142_v44  ;;  %v1155_v2 = vand.u32 2147483648, %v1142_v44  ;;  %vm1149_vm11 = vweird.f32 %v1142_v44  ;;  %v1153_v4 = vand.u32 2147483647, %v1142_v44  ;;  %1399 = vmatpush.msra.mxu2 %v2730_v59  ;;  %1466 = vmatpush.msra.mxu3 %v2730_v59 }
0x10bf   :  { %2151 = vrcp.f32 %v1143_v26  ;;  %v1170_v3 = vand.u32 2147483648, %v1143_v26  ;;  %vm1164_vm12 = vweird.f32 %v1143_v26  ;;  %v1168_v5 = vand.u32 2147483647, %v1143_v26 }
0x10c0   :  { %v1156_v9 = vor.u32 1.1754944e-38, %v1155_v2  ;;  %vm1154_vm15 = vcmp.eq.f32.partialorder %v1153_v4, 8.507059e+37  ;;  %1400 = vmatpush.msra.mxu2 %v2732_v60  ;;  %1467 = vmatpush.msra.mxu3 %v2732_v60 }
0x10c1   :  { %v1171_v11 = vor.u32 1.1754944e-38, %v1170_v3  ;;  %vm1169_vm1 = vcmp.eq.f32.partialorder %v1168_v5, 8.507059e+37  ;;  %v2027_v5 = vld [vmem:[%s2870_s6] ss:$0 sm:$0xff] }
0x10c2   :  { %1401 = vmatpush.msra.mxu2 %v2736_v48  ;;  %1468 = vmatpush.msra.mxu3 %v2736_v48 }
0x10c4   :  { %v2150_v28 = vpop.eup %2149  ;;  %1591 = vmatpush.msrb.mxu3 %v2724_v57  ;;  %1528 = vmatpush.msrb.mxu2 %v2724_v57 }
0x10c5   :  { %v2152_v41 = vpop.eup %2151  ;;  %v1145_v27 = vmul.f32 %v2150_v28, %v1142_v44  ;;  %vm1150_vm9 = vweird.f32 %v2150_v28  ;;  %v1994_v44 = vld [vmem:[%s2871_s7 + $0x2] sm:$0x3] }
0x10c6   :  { %v1160_v61 = vmul.f32 %v2152_v41, %v1143_v26  ;;  %vm1165_vm10 = vweird.f32 %v2152_v41  ;;  %vm1151_vm13 = vmor %vm1149_vm11, %vm1150_vm9  ;;  %vm1100_vm9 = vcmask 261254   ;;  %vm596_vm11 = vcmask 257154   ;;  %1996 = vmatmul.msk.f32.vlgmr.msra.gmra.mxu2 %vm115_vm0, %v1994_v44  ;;  %1592 = vmatpush.msrb.mxu3 %v2730_v59 }
0x10c7   :  { %v1146_v40 = vsub.f32 1.0, %v1145_v27  ;;  %vm1166_vm14 = vmor %vm1164_vm12, %vm1165_vm10  ;;  %vm594_vm10 = vcmask 125954   ;;  %vm972_vm12 = vcmask 129029   ;;  %1529 = vmatpush.msrb.mxu2 %v2730_v59 }
0x10c8   :  { %v1161_v39 = vsub.f32 1.0, %v1160_v61  ;;  %1593 = vmatpush.msrb.mxu3 %v2732_v60 }
0x10c9   :  { %v1147_v62 = vmul.f32 %v2150_v28, %v1146_v40  ;;  %1530 = vmatpush.msrb.mxu2 %v2732_v60 }
0x10ca   :  { %v1162_v63 = vmul.f32 %v2152_v41, %v1161_v39  ;;  %1594 = vmatpush.msrb.mxu3 %v2736_v48 }
0x10cb   :  { %v1148_v0 = vadd.f32 %v2150_v28, %v1147_v62  ;;  %1531 = vmatpush.msrb.mxu2 %v2736_v48 }
0x10cc   :  { %v1163_v1 = vadd.f32 %v2152_v41, %v1162_v63 }
0x10cd   :  { %v1152_v6 = vsel %vm1151_vm13, %v2150_v28, %v1148_v0  ;;  %vm974_vm13 = vcmask 260229   ;;  %v1995_v28 = vld [vmem:[%s2872_s8 + $0x2] sm:$0x3]  ;;  %1654 = vmatpush.msra.mxu2 %v2724_v57 }
0x10ce   :  { %v1167_v8 = vsel %vm1166_vm14, %v2152_v41, %v1163_v1  ;;  %v1157_v15 = vsel %vm1154_vm15, %v1156_v9, %v1152_v6  ;;  %vm720_vm14 = vcmask 126979   ;;  %vm722_vm15 = vcmask 258179  }
0x10cf   :  { %v1172_v17 = vsel %vm1169_vm1, %v1171_v11, %v1167_v8  ;;  %v1182_v37 = vmul.f32 %v1178_v31, %v1157_v15  ;;  %vm846_vm1 = vcmask 128004   ;;  %1655 = vmatpush.msra.mxu2 %v2730_v59 }
0x10d0   :  { %v1183_v21 = vmul.f32 %v1179_v20, %v1172_v17 }
0x10d1   :  { %1656 = vmatpush.msra.mxu2 %v2732_v60 }
0x10d3   :  { %1657 = vmatpush.msra.mxu2 %v2736_v48 }
0x112c   :  { %v1187_v12 = vpop.permute.xlu1 %1186 }
0x112d   :  { %v1189_v16 = vpop.permute.xlu0 %1188  ;;  %v1192_v18 = vmul.f32 %v1187_v12, %v1157_v15 }
0x112e   :  { %v1193_v19 = vmul.f32 %v1189_v16, %v1172_v17 }
0x112f   :  { %1196 = vrot.lane.b32.xlu0 %v1192_v18, %s2382_s30 }
0x1130   :  { %1198 = vrot.lane.b32.xlu2 %v1193_v19, %s2382_s30 }
0x118a   :  { %v1199_v22 = vpop.permute.xlu2 %1198 }
0x118b   :  { %v1203_v29 = vadd.f32 %v1199_v22, %v1183_v21 }
0x118d   :  { %2153 = vtanh.f32 %v1203_v29 }
0x1193   :  { %v2154_v30 = vpop.eup %2153 }
0x1194   :  { %1210 = vrot.lane.b32.xlu1 %v2154_v30, %s2383_s3 }
0x11a1   :  { %v1197_v38 = vpop.permute.xlu0 %1196 }
0x11a2   :  { %v1202_v25 = vadd.f32 %v1197_v38, %v1182_v37 }
0x11a4   :  { %2155 = vtanh.f32 %v1202_v25 }
0x11aa   :  { %v2156_v24 = vpop.eup %2155 }
0x11ab   :  { %1208 = vrot.lane.b32.xlu2 %v2156_v24, %s2383_s3 }
0x11b3   :  { %466 = vrot.lane.b32.xlu2 %v2586_v43, %s2382_s30  ;;  %v1249_v43 = vld [vmem:[#allocation8 + $0x38] sm:$0xff] }
0x11b4   :  { %1327 = vmatpush.msrb.mxu1 %v1249_v43 }
0x11b6   :  { %1328 = vmatpush.msrb.mxu1 %v1247_v47 }
0x11b8   :  { %1329 = vmatpush.msrb.mxu1 %v1245_v51 }
0x11bb   :  { %969 = vrot.lane.b32.xlu2 %v2671_v34, %s2382_s30  ;;  %v1248_v34 = vld [vmem:[#allocation8 + $0x30] sm:$0xff] }
0x11bc   :  { %1286 = vmatpush.msrb.mxu0 %v1248_v34 }
0x11be   :  { %1287 = vmatpush.msrb.mxu0 %v1246_v49 }
0x11c0   :  { %1288 = vmatpush.msrb.mxu0 %v1244_v52 }
0x1205   :  { %v1209_v42 = vpop.permute.xlu2 %1208 }
0x1206   :  { %v1211_v32 = vpop.permute.xlu1 %1210  ;;  %v1214_v35 = vmul.f32 %v1209_v42, %v1157_v15 }
0x1207   :  { %v1215_v45 = vmul.f32 %v1211_v32, %v1172_v17 }
0x1208   :  { %1219 = vrot.lane.b32.xlu0 %v1214_v35, %s2382_s30  ;;  %v1403_v35 = vpop.f32.mrf.mxu2 }
0x1209   :  { %v1218_v33 = vrot.slane %v1215_v45, 7 }
0x120b   :  { %1221 = vrot.lane.b32.xlu1 %v1218_v33, %s2382_s30 }
0x120d   :  { %v467_v46 = vpop.permute.xlu2 %466 }
0x120e   :  { %470 = vst.msk [vmem:[#allocation2 + $0x7] sm:$0x6] %vm469_vm2, %v467_v46  ;;  %vm848_vm2 = vcmask 259204  }
0x120f   :  { %472 = vst.msk [vmem:[#allocation2 + $0x2f] sm:$0x6] %vm471_vm3, %v467_v46 }
0x1210   :  { %1095 = vrot.lane.b32.xlu0 %v2692_v53, %s2382_s30  ;;  %v1243_v53 = vld [vmem:[#allocation8 + $0x8] sm:$0xff] }
0x1211   :  { %1330 = vmatpush.msrb.mxu1 %v1243_v53 }
0x1213   :  { %591 = vrot.lane.b32.xlu1 %v2608_v23, %s2382_s30  ;;  %v1242_v23 = vld [vmem:[#allocation8] sm:$0xff] }
0x1214   :  { %1289 = vmatpush.msrb.mxu0 %v1242_v23 }
0x1215   :  { %v970_v14 = vpop.permute.xlu2 %969 }
0x1218   :  { %717 = vrot.lane.b32.xlu0 %v2629_v50, %s2382_s30 }
0x121b   :  { %843 = vrot.lane.b32.xlu1 %v2650_v36, %s2382_s30 }
0x1220   :  { %1428 = vrot.lane.b32.xlu0 %v1995_v28, %s2382_s30 }
0x127a   :  { %v1220_v50 = vpop.permute.xlu0 %1219 }
0x127b   :  { %1226 = vst.msk [vmem:[#allocation2 + $0x31] sm:$0x80] %vm1225_vm4, %v1220_v50 }
0x127c   :  { %1230 = vst.msk [vmem:[#allocation2 - $0x7] sm:$0x80] %vm1229_vm5, %v1220_v50 }
0x127d   :  { %v1222_v36 = vpop.permute.xlu1 %1221 }
0x127e   :  { %1228 = vst.msk [vmem:[#allocation2 + $0x39] sm:$0x1] %vm1227_vm6, %v1222_v36 }
0x127f   :  { %1232 = vst.msk [vmem:[#allocation2 + $0x1] sm:$0x1] %vm1231_vm7, %v1222_v36 }
0x1282   :  { %v1096_v7 = vpop.permute.xlu0 %1095 }
0x1283   :  { %1099 = vst.msk [vmem:[#allocation2 + $0x2a] sm:$0xc0] %vm1098_vm8, %v1096_v7 }
0x1284   :  { %1101 = vst.msk [vmem:[#allocation2 + $0x2] sm:$0xc0] %vm1100_vm9, %v1096_v7 }
0x1285   :  { %v592_v10 = vpop.permute.xlu1 %591  ;;  %v1241_v40 = vld [vmem:[#allocation2 + $0x38] sm:$0xff] }
0x1286   :  { %595 = vst.msk [vmem:[#allocation2 + $0xe] sm:$0xc] %vm594_vm10, %v592_v10  ;;  %v1234_v13 = vld [vmem:[#allocation2] sm:$0xff] }
0x1287   :  { %597 = vst.msk [vmem:[#allocation2 + $0x26] sm:$0xc] %vm596_vm11, %v592_v10  ;;  %1978 = vmatmul.msk.f32.vlgmr.msrb.gmra.mxu0 %vm115_vm0, %v1234_v13  ;;  %1986 = vmatmul.msk.f32.vlgmr.msrb.gmra.mxu1 %vm115_vm0, %v1234_v13 }
0x1288   :  { %973 = vst.msk [vmem:[#allocation2 + $0x23] sm:$0x60] %vm972_vm12, %v970_v14 }
0x1289   :  { %975 = vst.msk [vmem:[#allocation2 + $0xb] sm:$0x60] %vm974_vm13, %v970_v14 }
0x128a   :  { %v718_v54 = vpop.permute.xlu0 %717  ;;  %v1240_v61 = vld [vmem:[#allocation2 + $0x30] sm:$0xff] }
0x128b   :  { %721 = vst.msk [vmem:[#allocation2 + $0x15] sm:$0x18] %vm720_vm14, %v718_v54  ;;  %v1235_v56 = vld [vmem:[#allocation2 + $0x8] sm:$0xff] }
0x128c   :  { %723 = vst.msk [vmem:[#allocation2 + $0x1d] sm:$0x18] %vm722_vm15, %v718_v54 }
0x128d   :  { %v844_v55 = vpop.permute.xlu1 %843 }
0x128e   :  { %847 = vst.msk [vmem:[#allocation2 + $0x1c] sm:$0x30] %vm846_vm1, %v844_v55 }
0x128f   :  { %849 = vst.msk [vmem:[#allocation2 + $0x14] sm:$0x30] %vm848_vm2, %v844_v55  ;;  %1979 = vmatmul.msk.f32.gmra.mxu0 %vm115_vm0, %v1235_v56  ;;  %1987 = vmatmul.msk.f32.gmra.mxu1 %vm115_vm0, %v1235_v56  ;;  %v1239_v27 = vld [vmem:[#allocation2 + $0x28] sm:$0xff] }
0x1290   :  { %v1236_v58 = vld [vmem:[#allocation2 + $0x10] sm:$0xff] }
0x1292   :  { %v1429_v56 = vpop.permute.xlu0 %1428 }
0x1295   :  { %v1238_v41 = vld [vmem:[#allocation2 + $0x20] sm:$0xff] }
0x1296   :  { %v1237_v26 = vld [vmem:[#allocation2 + $0x18] sm:$0xff] }
0x1297   :  { %1980 = vmatmul.msk.f32.gmra.mxu0 %vm115_vm0, %v1236_v58  ;;  %1988 = vmatmul.msk.f32.gmra.mxu1 %vm115_vm0, %v1236_v58 }
0x129f   :  { %1981 = vmatmul.msk.f32.gmra.mxu0 %vm115_vm0, %v1237_v26  ;;  %1989 = vmatmul.msk.f32.gmra.mxu1 %vm115_vm0, %v1237_v26 }
0x12a7   :  { %1982 = vmatmul.msk.f32.gmra.mxu0 %vm115_vm0, %v1238_v41  ;;  %1990 = vmatmul.msk.f32.gmra.mxu1 %vm115_vm0, %v1238_v41 }
0x12af   :  { %1983 = vmatmul.msk.f32.gmra.mxu0 %vm115_vm0, %v1239_v27  ;;  %1991 = vmatmul.msk.f32.gmra.mxu1 %vm115_vm0, %v1239_v27 }
0x12b7   :  { %1984 = vmatmul.msk.f32.gmra.mxu0 %vm115_vm0, %v1240_v61  ;;  %1992 = vmatmul.msk.f32.gmra.mxu1 %vm115_vm0, %v1240_v61 }
0x12bf   :  { %1985 = vmatmul.msk.f32.gmra.mxu0 %vm115_vm0, %v1241_v40  ;;  %1993 = vmatmul.msk.f32.gmra.mxu1 %vm115_vm0, %v1241_v40 }
0x1304   :  { %v1291_v39 = vpop.f32.mrf.mxu0  ;;  %v1332_v62 = vpop.f32.mrf.mxu1 }
0x130c   :  { %v1294_v63 = vpop.f32.mrf.mxu0  ;;  %v1335_v0 = vpop.f32.mrf.mxu1 }
0x1314   :  { %v1297_v1 = vpop.f32.mrf.mxu0  ;;  %v1338_v2 = vpop.f32.mrf.mxu1 }
0x131c   :  { %v1300_v3 = vpop.f32.mrf.mxu0  ;;  %v1341_v4 = vpop.f32.mrf.mxu1 }
0x1324   :  { %v1303_v6 = vpop.f32.mrf.mxu0  ;;  %v1344_v8 = vpop.f32.mrf.mxu1 }
0x1325   :  { %v1367_v9 = vadd.f32 %v1341_v4, %v1303_v6  ;;  %v1365_v11 = vadd.f32 %v1344_v8, %v1300_v3 }
0x1327   :  { %v2775_v12 = vadd.f32 %v2027_v5, %v1365_v11  ;;  %v2777_v15 = vadd.f32 %v2027_v5, %v1367_v9 }
0x132c   :  { %v1306_v16 = vpop.f32.mrf.mxu0  ;;  %v1347_v17 = vpop.f32.mrf.mxu1 }
0x132d   :  { %v1369_v18 = vadd.f32 %v1338_v2, %v1306_v16  ;;  %v1363_v19 = vadd.f32 %v1347_v17, %v1297_v1 }
0x132f   :  { %v2779_v20 = vadd.f32 %v2027_v5, %v1363_v19  ;;  %v2781_v21 = vadd.f32 %v2027_v5, %v1369_v18 }
0x1334   :  { %v1309_v22 = vpop.f32.mrf.mxu0  ;;  %v1350_v29 = vpop.f32.mrf.mxu1 }
0x1335   :  { %v1371_v30 = vadd.f32 %v1335_v0, %v1309_v22  ;;  %v1361_v31 = vadd.f32 %v1350_v29, %v1294_v63 }
0x1337   :  { %v1362_v37 = vadd.f32 %v2027_v5, %v1361_v31  ;;  %v2783_v38 = vadd.f32 %v2027_v5, %v1371_v30 }
0x133c   :  { %v1312_v25 = vpop.f32.mrf.mxu0  ;;  %v1353_v24 = vpop.f32.mrf.mxu1 }
0x133d   :  { %v1373_v42 = vadd.f32 %v1332_v62, %v1312_v25  ;;  %v1356_v32 = vadd.f32 %v1353_v24, %v1291_v39 }
0x133f   :  { %v1360_v45 = vadd.f32 %v2027_v5, %v1356_v32  ;;  %v2785_v33 = vadd.f32 %v2027_v5, %v1373_v42 }
0x1341   :  { %v1406_v46 = vadd.f32 %v1403_v35, %v1360_v45 }
0x1343   :  { %2157 = vtanh.f32 %v1406_v46  ;;  %v1997_v34 = vmul.f32 -1.442695, %v1406_v46 }
0x1345   :  { %2159 = vpow2.f32 %v1997_v34 }
0x1349   :  { %v2158_v43 = vpop.eup %2157 }
0x134a   :  { %1433 = vrot.lane.b32.xlu2 %v2158_v43, %s2383_s3 }
0x134b   :  { %v2160_v47 = vpop.eup %2159 }
0x134c   :  { %v1410_v49 = vadd.f32 1.0, %v2160_v47 }
0x134e   :  { %2161 = vrcp.f32 %v1410_v49  ;;  %v1422_v36 = vand.u32 2147483648, %v1410_v49  ;;  %vm1416_vm4 = vweird.f32 %v1410_v49  ;;  %v1420_v7 = vand.u32 2147483647, %v1410_v49 }
0x1350   :  { %v1423_v13 = vor.u32 1.1754944e-38, %v1422_v36  ;;  %vm1421_vm6 = vcmp.eq.f32.partialorder %v1420_v7, 8.507059e+37 }
0x1354   :  { %v2162_v51 = vpop.eup %2161 }
0x1355   :  { %v1412_v52 = vmul.f32 %v2162_v51, %v1410_v49  ;;  %vm1417_vm3 = vweird.f32 %v2162_v51 }
0x1356   :  { %vm1418_vm5 = vmor %vm1416_vm4, %vm1417_vm3 }
0x1357   :  { %v1413_v53 = vsub.f32 1.0, %v1412_v52 }
0x1359   :  { %v1414_v23 = vmul.f32 %v2162_v51, %v1413_v53 }
0x135b   :  { %v1415_v50 = vadd.f32 %v2162_v51, %v1414_v23 }
0x135d   :  { %v1419_v10 = vsel %vm1418_vm5, %v2162_v51, %v1415_v50 }
0x135e   :  { %v1424_v14 = vsel %vm1421_vm6, %v1423_v13, %v1419_v10 }
0x135f   :  { %v1431_v58 = vmul.f32 %v1429_v56, %v1424_v14 }
0x13a4   :  { %v1434_v54 = vpop.permute.xlu2 %1433 }
0x13a5   :  { %v1436_v55 = vmul.f32 %v1434_v54, %v1424_v14 }
0x13a7   :  { %1438 = vrot.lane.b32.xlu1 %v1436_v55, %s2382_s30 }
0x1419   :  { %v1439_v44 = vpop.permute.xlu1 %1438 }
0x141a   :  { %v1441_v26 = vadd.f32 %v1439_v44, %v1431_v58 }
0x141c   :  { %2163 = vtanh.f32 %v1441_v26 }
0x1422   :  { %v2164_v28 = vpop.eup %2163 }
0x1423   :  { %1444 = vrot.lane.b32.xlu2 %v2164_v28, %s2383_s3 }
0x147d   :  { %v1445_v41 = vpop.permute.xlu2 %1444 }
0x147e   :  { %v1447_v27 = vmul.f32 %v1445_v41, %v1424_v14 }
0x1480   :  { %1449 = vrot.lane.b32.xlu0 %v1447_v27, %s2382_s30 }
0x14f2   :  { %v2791_v61 = vpop.permute.xlu0 %1449 }
0x14f3   :  { %1998 = vmatmul.msk.f32.vlgmr.msra.gmra.mxu3 %vm115_vm0, %v2791_v61 }
0x14f4   :  { %1717 = vmatpush.msra.mxu3 %v2724_v57 }
0x14f6   :  { %1718 = vmatpush.msra.mxu3 %v2730_v59 }
0x14f8   :  { %1719 = vmatpush.msra.mxu3 %v2732_v60 }
0x14fa   :  { %1720 = vmatpush.msra.mxu3 %v2736_v48 }
0x1576   :  { %v1470_v40 = vpop.f32.mrf.mxu3 }
0x1577   :  { %v1473_v39 = vadd.f32 %v1470_v40, %v1362_v37 }
0x1579   :  { %2165 = vtanh.f32 %v1473_v39  ;;  %v1999_v63 = vmul.f32 -1.442695, %v1473_v39 }
0x157b   :  { %2167 = vpow2.f32 %v1999_v63 }
0x157f   :  { %v2166_v62 = vpop.eup %2165 }
0x1580   :  { %1496 = vrot.lane.b32.xlu1 %v2166_v62, %s2383_s3 }
0x1581   :  { %v2168_v0 = vpop.eup %2167 }
0x1582   :  { %v1477_v1 = vadd.f32 1.0, %v2168_v0 }
0x1584   :  { %2169 = vrcp.f32 %v1477_v1  ;;  %v1489_v8 = vand.u32 2147483648, %v1477_v1  ;;  %vm1483_vm8 = vweird.f32 %v1477_v1  ;;  %v1487_v9 = vand.u32 2147483647, %v1477_v1 }
0x1586   :  { %v1490_v16 = vor.u32 1.1754944e-38, %v1489_v8  ;;  %vm1488_vm10 = vcmp.eq.f32.partialorder %v1487_v9, 8.507059e+37 }
0x158a   :  { %v2170_v2 = vpop.eup %2169 }
0x158b   :  { %v1479_v3 = vmul.f32 %v2170_v2, %v1477_v1  ;;  %vm1484_vm7 = vweird.f32 %v2170_v2 }
0x158c   :  { %vm1485_vm9 = vmor %vm1483_vm8, %vm1484_vm7 }
0x158d   :  { %v1480_v4 = vsub.f32 1.0, %v1479_v3 }
0x158f   :  { %v1481_v5 = vmul.f32 %v2170_v2, %v1480_v4 }
0x1591   :  { %v1482_v6 = vadd.f32 %v2170_v2, %v1481_v5 }
0x1593   :  { %v1486_v11 = vsel %vm1485_vm9, %v2170_v2, %v1482_v6 }
0x1594   :  { %v1491_v18 = vsel %vm1488_vm10, %v1490_v16, %v1486_v11 }
0x1595   :  { %v1494_v22 = vmul.f32 %v1491_v18, %v1441_v26 }
0x15f2   :  { %v1497_v17 = vpop.permute.xlu1 %1496 }
0x15f3   :  { %v1499_v19 = vmul.f32 %v1497_v17, %v1491_v18 }
0x15f5   :  { %1501 = vrot.lane.b32.xlu2 %v1499_v19, %s2382_s30 }
0x164f   :  { %v1502_v29 = vpop.permute.xlu2 %1501 }
0x1650   :  { %v1504_v30 = vadd.f32 %v1502_v29, %v1494_v22 }
0x1652   :  { %2171 = vtanh.f32 %v1504_v30 }
0x1658   :  { %v2172_v31 = vpop.eup %2171 }
0x1659   :  { %1507 = vrot.lane.b32.xlu0 %v2172_v31, %s2383_s3 }
0x16cb   :  { %v1508_v37 = vpop.permute.xlu0 %1507 }
0x16cc   :  { %v1510_v25 = vmul.f32 %v1508_v37, %v1491_v18 }
0x16ce   :  { %1512 = vrot.lane.b32.xlu1 %v1510_v25, %s2382_s30 }
0x1740   :  { %v1513_v24 = vpop.permute.xlu1 %1512 }
0x1741   :  { %2000 = vmatmul.msk.f32.vlgmr.msrb.gmra.mxu2 %vm115_vm0, %v1513_v24 }
0x1742   :  { %1780 = vmatpush.msrb.mxu2 %v2724_v57 }
0x1744   :  { %1781 = vmatpush.msrb.mxu2 %v2730_v59 }
0x1746   :  { %1782 = vmatpush.msrb.mxu2 %v2732_v60 }
0x1748   :  { %1783 = vmatpush.msrb.mxu2 %v2736_v48 }
0x17c4   :  { %v1533_v42 = vpop.f32.mrf.mxu2 }
0x17c5   :  { %v1536_v32 = vadd.f32 %v1533_v42, %v2779_v20 }
0x17c7   :  { %2173 = vtanh.f32 %v1536_v32  ;;  %v2001_v45 = vmul.f32 -1.442695, %v1536_v32 }
0x17c9   :  { %2175 = vpow2.f32 %v2001_v45 }
0x17cd   :  { %v2174_v35 = vpop.eup %2173 }
0x17ce   :  { %1559 = vrot.lane.b32.xlu2 %v2174_v35, %s2383_s3 }
0x17cf   :  { %v2176_v46 = vpop.eup %2175 }
0x17d0   :  { %v1540_v43 = vadd.f32 1.0, %v2176_v46 }
0x17d2   :  { %2177 = vrcp.f32 %v1540_v43  ;;  %v1552_v53 = vand.u32 2147483648, %v1540_v43  ;;  %vm1546_vm12 = vweird.f32 %v1540_v43  ;;  %v1550_v23 = vand.u32 2147483647, %v1540_v43 }
0x17d4   :  { %v1553_v50 = vor.u32 1.1754944e-38, %v1552_v53  ;;  %vm1551_vm14 = vcmp.eq.f32.partialorder %v1550_v23, 8.507059e+37 }
0x17d8   :  { %v2178_v34 = vpop.eup %2177 }
0x17d9   :  { %v1542_v47 = vmul.f32 %v2178_v34, %v1540_v43  ;;  %vm1547_vm11 = vweird.f32 %v2178_v34 }
0x17da   :  { %vm1548_vm13 = vmor %vm1546_vm12, %vm1547_vm11 }
0x17db   :  { %v1543_v49 = vsub.f32 1.0, %v1542_v47 }
0x17dd   :  { %v1544_v51 = vmul.f32 %v2178_v34, %v1543_v49 }
0x17df   :  { %v1545_v52 = vadd.f32 %v2178_v34, %v1544_v51 }
0x17e1   :  { %v1549_v20 = vsel %vm1548_vm13, %v2178_v34, %v1545_v52 }
0x17e2   :  { %v1554_v7 = vsel %vm1551_vm14, %v1553_v50, %v1549_v20 }
0x17e3   :  { %v1557_v13 = vmul.f32 %v1554_v7, %v1504_v30 }
0x1828   :  { %v1560_v36 = vpop.permute.xlu2 %1559 }
0x1829   :  { %v1562_v10 = vmul.f32 %v1560_v36, %v1554_v7 }
0x182b   :  { %1564 = vrot.lane.b32.xlu0 %v1562_v10, %s2382_s30 }
0x189d   :  { %v1565_v14 = vpop.permute.xlu0 %1564 }
0x189e   :  { %v1567_v54 = vadd.f32 %v1565_v14, %v1557_v13 }
0x18a0   :  { %2179 = vtanh.f32 %v1567_v54 }
0x18a6   :  { %v2180_v55 = vpop.eup %2179 }
0x18a7   :  { %1570 = vrot.lane.b32.xlu1 %v2180_v55, %s2383_s3 }
0x1919   :  { %v1571_v56 = vpop.permute.xlu1 %1570 }
0x191a   :  { %v1573_v58 = vmul.f32 %v1571_v56, %v1554_v7 }
0x191c   :  { %1575 = vrot.lane.b32.xlu2 %v1573_v58, %s2382_s30 }
0x1976   :  { %v1576_v44 = vpop.permute.xlu2 %1575 }
0x1977   :  { %2002 = vmatmul.msk.f32.vlgmr.msrb.gmra.mxu3 %vm115_vm0, %v1576_v44 }
0x1978   :  { %1843 = vmatpush.msrb.mxu3 %v2724_v57 }
0x197a   :  { %1844 = vmatpush.msrb.mxu3 %v2730_v59 }
0x197c   :  { %1845 = vmatpush.msrb.mxu3 %v2732_v60 }
0x197e   :  { %1846 = vmatpush.msrb.mxu3 %v2736_v48 }
0x19fa   :  { %v1596_v26 = vpop.f32.mrf.mxu3 }
0x19fb   :  { %v1599_v28 = vadd.f32 %v1596_v26, %v2775_v12 }
0x19fd   :  { %2181 = vtanh.f32 %v1599_v28  ;;  %v2003_v27 = vmul.f32 -1.442695, %v1599_v28 }
0x19ff   :  { %2183 = vpow2.f32 %v2003_v27 }
0x1a03   :  { %v2182_v41 = vpop.eup %2181 }
0x1a04   :  { %1622 = vrot.lane.b32.xlu0 %v2182_v41, %s2383_s3 }
0x1a05   :  { %v2184_v40 = vpop.eup %2183 }
0x1a06   :  { %v1603_v39 = vadd.f32 1.0, %v2184_v40 }
0x1a08   :  { %2185 = vrcp.f32 %v1603_v39  ;;  %v1615_v60 = vand.u32 2147483648, %v1603_v39  ;;  %vm1609_vm1 = vweird.f32 %v1603_v39  ;;  %v1613_v48 = vand.u32 2147483647, %v1603_v39 }
0x1a0a   :  { %v1616_v1 = vor.u32 1.1754944e-38, %v1615_v60  ;;  %vm1614_vm3 = vcmp.eq.f32.partialorder %v1613_v48, 8.507059e+37 }
0x1a0e   :  { %v2186_v62 = vpop.eup %2185 }
0x1a0f   :  { %v1605_v57 = vmul.f32 %v2186_v62, %v1603_v39  ;;  %vm1610_vm15 = vweird.f32 %v2186_v62 }
0x1a10   :  { %vm1611_vm2 = vmor %vm1609_vm1, %vm1610_vm15 }
0x1a11   :  { %v1606_v63 = vsub.f32 1.0, %v1605_v57 }
0x1a13   :  { %v1607_v59 = vmul.f32 %v2186_v62, %v1606_v63 }
0x1a15   :  { %v1608_v0 = vadd.f32 %v2186_v62, %v1607_v59 }
0x1a17   :  { %v1612_v12 = vsel %vm1611_vm2, %v2186_v62, %v1608_v0 }
0x1a18   :  { %v1617_v3 = vsel %vm1614_vm3, %v1616_v1, %v1612_v12 }
0x1a19   :  { %v1620_v5 = vmul.f32 %v1617_v3, %v1567_v54 }
0x1a76   :  { %v1623_v2 = vpop.permute.xlu0 %1622 }
0x1a77   :  { %v1625_v4 = vmul.f32 %v1623_v2, %v1617_v3 }
0x1a79   :  { %1627 = vrot.lane.b32.xlu1 %v1625_v4, %s2382_s30 }
0x1aeb   :  { %v1628_v6 = vpop.permute.xlu1 %1627 }
0x1aec   :  { %v1630_v8 = vadd.f32 %v1628_v6, %v1620_v5 }
0x1aee   :  { %2187 = vtanh.f32 %v1630_v8 }
0x1af4   :  { %v2188_v9 = vpop.eup %2187 }
0x1af5   :  { %1633 = vrot.lane.b32.xlu2 %v2188_v9, %s2383_s3 }
0x1b4f   :  { %v1634_v11 = vpop.permute.xlu2 %1633 }
0x1b50   :  { %v1636_v16 = vmul.f32 %v1634_v11, %v1617_v3 }
0x1b52   :  { %1638 = vrot.lane.b32.xlu0 %v1636_v16, %s2382_s30 }
0x1bc4   :  { %v1639_v17 = vpop.permute.xlu0 %1638 }
0x1bc5   :  { %2004 = vmatmul.msk.f32.vlgmr.msra.gmra.mxu2 %vm115_vm0, %v1639_v17 }
0x1c48   :  { %v1659_v18 = vpop.f32.mrf.mxu2 }
0x1c49   :  { %v1662_v19 = vadd.f32 %v1659_v18, %v2777_v15 }
0x1c4b   :  { %2189 = vtanh.f32 %v1662_v19  ;;  %v2005_v29 = vmul.f32 -1.442695, %v1662_v19 }
0x1c4d   :  { %2191 = vpow2.f32 %v2005_v29 }
0x1c51   :  { %v2190_v22 = vpop.eup %2189 }
0x1c52   :  { %1685 = vrot.lane.b32.xlu1 %v2190_v22, %s2383_s3 }
0x1c53   :  { %v2192_v30 = vpop.eup %2191 }
0x1c54   :  { %v1666_v31 = vadd.f32 1.0, %v2192_v30 }
0x1c56   :  { %2193 = vrcp.f32 %v1666_v31  ;;  %v1678_v35 = vand.u32 2147483648, %v1666_v31  ;;  %vm1672_vm5 = vweird.f32 %v1666_v31  ;;  %v1676_v45 = vand.u32 2147483647, %v1666_v31 }
0x1c58   :  { %v1679_v46 = vor.u32 1.1754944e-38, %v1678_v35  ;;  %vm1677_vm7 = vcmp.eq.f32.partialorder %v1676_v45, 8.507059e+37 }
0x1c5c   :  { %v2194_v37 = vpop.eup %2193 }
0x1c5d   :  { %v1668_v25 = vmul.f32 %v2194_v37, %v1666_v31  ;;  %vm1673_vm4 = vweird.f32 %v2194_v37 }
0x1c5e   :  { %vm1674_vm6 = vmor %vm1672_vm5, %vm1673_vm4 }
0x1c5f   :  { %v1669_v24 = vsub.f32 1.0, %v1668_v25 }
0x1c61   :  { %v1670_v42 = vmul.f32 %v2194_v37, %v1669_v24 }
0x1c63   :  { %v1671_v32 = vadd.f32 %v2194_v37, %v1670_v42 }
0x1c65   :  { %v1675_v15 = vsel %vm1674_vm6, %v2194_v37, %v1671_v32  ;;  %vm1929_vm6 = vcmask 17408  }
0x1c66   :  { %v1680_v34 = vsel %vm1677_vm7, %v1679_v46, %v1675_v15 }
0x1c67   :  { %v1683_v49 = vmul.f32 %v1680_v34, %v1630_v8 }
0x1cc4   :  { %v1686_v43 = vpop.permute.xlu1 %1685 }
0x1cc5   :  { %v1688_v47 = vmul.f32 %v1686_v43, %v1680_v34 }
0x1cc7   :  { %1690 = vrot.lane.b32.xlu2 %v1688_v47, %s2382_s30 }
0x1d21   :  { %v1691_v51 = vpop.permute.xlu2 %1690 }
0x1d22   :  { %v1693_v52 = vadd.f32 %v1691_v51, %v1683_v49 }
0x1d24   :  { %2195 = vtanh.f32 %v1693_v52 }
0x1d2a   :  { %v2196_v53 = vpop.eup %2195 }
0x1d2b   :  { %1696 = vrot.lane.b32.xlu0 %v2196_v53, %s2383_s3 }
0x1d9d   :  { %v1697_v23 = vpop.permute.xlu0 %1696 }
0x1d9e   :  { %v1699_v20 = vmul.f32 %v1697_v23, %v1680_v34 }
0x1da0   :  { %1701 = vrot.lane.b32.xlu1 %v1699_v20, %s2382_s30 }
0x1e12   :  { %v1702_v50 = vpop.permute.xlu1 %1701 }
0x1e13   :  { %2006 = vmatmul.msk.f32.vlgmr.msra.gmra.mxu3 %vm115_vm0, %v1702_v50 }
0x1e96   :  { %v1722_v36 = vpop.f32.mrf.mxu3 }
0x1e97   :  { %v1725_v7 = vadd.f32 %v1722_v36, %v2781_v21 }
0x1e99   :  { %2197 = vtanh.f32 %v1725_v7  ;;  %v2007_v13 = vmul.f32 -1.442695, %v1725_v7 }
0x1e9b   :  { %2199 = vpow2.f32 %v2007_v13 }
0x1e9f   :  { %v2198_v10 = vpop.eup %2197 }
0x1ea0   :  { %1748 = vrot.lane.b32.xlu2 %v2198_v10, %s2383_s3 }
0x1ea1   :  { %v2200_v14 = vpop.eup %2199 }
0x1ea2   :  { %v1729_v54 = vadd.f32 1.0, %v2200_v14 }
0x1ea4   :  { %2201 = vrcp.f32 %v1729_v54  ;;  %v1741_v28 = vand.u32 2147483648, %v1729_v54  ;;  %vm1735_vm9 = vweird.f32 %v1729_v54  ;;  %v1739_v41 = vand.u32 2147483647, %v1729_v54 }
0x1ea6   :  { %v1742_v27 = vor.u32 1.1754944e-38, %v1741_v28  ;;  %vm1740_vm11 = vcmp.eq.f32.partialorder %v1739_v41, 8.507059e+37  ;;  %v1899_v28 = vld [vmem:[%s2873_s9 + $0x8] sm:$0xff]  ;;  %v1898_v41 = vld [vmem:[%s2873_s9] sm:$0xff] }
0x1eaa   :  { %v2202_v55 = vpop.eup %2201 }
0x1eab   :  { %v1731_v56 = vmul.f32 %v2202_v55, %v1729_v54  ;;  %vm1736_vm8 = vweird.f32 %v2202_v55 }
0x1eac   :  { %vm1737_vm10 = vmor %vm1735_vm9, %vm1736_vm8 }
0x1ead   :  { %v1732_v58 = vsub.f32 1.0, %v1731_v56 }
0x1eaf   :  { %v1733_v44 = vmul.f32 %v2202_v55, %v1732_v58 }
0x1eb1   :  { %v1734_v26 = vadd.f32 %v2202_v55, %v1733_v44  ;;  %v1901_v44 = vld [vmem:[%s2873_s9 + $0x18] sm:$0xff] }
0x1eb2   :  { %1921 = vmatpush.msra.mxu2 %v1901_v44 }
0x1eb3   :  { %v1738_v21 = vsel %vm1737_vm10, %v2202_v55, %v1734_v26  ;;  %v1900_v26 = vld [vmem:[%s2873_s9 + $0x10] sm:$0xff]  ;;  %s1938_s9 = sshll.u32 %s2875_s11, 4  ;;  %s1939_s9 = int_to_ptr.hbm [resolvable:$true] %s1938_s9 }
0x1eb4   :  { %v1743_v39 = vsel %vm1740_vm11, %v1742_v27, %v1738_v21  ;;  %1922 = vmatpush.msra.mxu2 %v1900_v26 }
0x1eb5   :  { %v1746_v57 = vmul.f32 %v1743_v39, %v1693_v52 }
0x1eb6   :  { %1923 = vmatpush.msra.mxu2 %v1899_v28 }
0x1eb8   :  { %1924 = vmatpush.msra.mxu2 %v1898_v41 }
0x1efa   :  { %v1749_v40 = vpop.permute.xlu2 %1748 }
0x1efb   :  { %v1751_v62 = vmul.f32 %v1749_v40, %v1743_v39  ;;  %v1889_v40 = vlaneseq }
0x1efd   :  { %1753 = vrot.lane.b32.xlu0 %v1751_v62, %s2382_s30 }
0x1f6f   :  { %v1754_v63 = vpop.permute.xlu0 %1753 }
0x1f70   :  { %v1756_v59 = vadd.f32 %v1754_v63, %v1746_v57  ;;  %v2028_v63 = vld [vmem:[#allocation11] ss:$0 sm:$0xff] }
0x1f72   :  { %2203 = vtanh.f32 %v1756_v59 }
0x1f78   :  { %v2204_v0 = vpop.eup %2203 }
0x1f79   :  { %1759 = vrot.lane.b32.xlu1 %v2204_v0, %s2383_s3 }
0x1feb   :  { %v1760_v60 = vpop.permute.xlu1 %1759 }
0x1fec   :  { %v1762_v48 = vmul.f32 %v1760_v60, %v1743_v39  ;;  %v1890_v39 = vand.u32 127, %v1889_v40 }
0x1fee   :  { %1764 = vrot.lane.b32.xlu2 %v1762_v48, %s2382_s30  ;;  %vm1891_vm5 = vcmp.lt.s32.totalorder %v1890_v39, 16 }
0x2048   :  { %v1765_v12 = vpop.permute.xlu2 %1764 }
0x2049   :  { %2008 = vmatmul.msk.f32.vlgmr.msrb.gmra.mxu2 %vm115_vm0, %v1765_v12 }
0x20cc   :  { %v1785_v1 = vpop.f32.mrf.mxu2 }
0x20cd   :  { %v1788_v2 = vadd.f32 %v1785_v1, %v2783_v38 }
0x20cf   :  { %2205 = vtanh.f32 %v1788_v2  ;;  %v2009_v4 = vmul.f32 -1.442695, %v1788_v2 }
0x20d1   :  { %2207 = vpow2.f32 %v2009_v4 }
0x20d5   :  { %v2206_v3 = vpop.eup %2205 }
0x20d6   :  { %1811 = vrot.lane.b32.xlu0 %v2206_v3, %s2383_s3 }
0x20d7   :  { %v2208_v5 = vpop.eup %2207 }
0x20d8   :  { %v1792_v6 = vadd.f32 1.0, %v2208_v5 }
0x20da   :  { %2209 = vrcp.f32 %v1792_v6  ;;  %v1804_v18 = vand.u32 2147483648, %v1792_v6  ;;  %vm1798_vm13 = vweird.f32 %v1792_v6  ;;  %v1802_v19 = vand.u32 2147483647, %v1792_v6 }
0x20dc   :  { %v1805_v22 = vor.u32 1.1754944e-38, %v1804_v18  ;;  %vm1803_vm15 = vcmp.eq.f32.partialorder %v1802_v19, 8.507059e+37 }
0x20e0   :  { %v2210_v8 = vpop.eup %2209 }
0x20e1   :  { %v1794_v9 = vmul.f32 %v2210_v8, %v1792_v6  ;;  %vm1799_vm12 = vweird.f32 %v2210_v8 }
0x20e2   :  { %vm1800_vm14 = vmor %vm1798_vm13, %vm1799_vm12 }
0x20e3   :  { %v1795_v11 = vsub.f32 1.0, %v1794_v9 }
0x20e5   :  { %v1796_v16 = vmul.f32 %v2210_v8, %v1795_v11 }
0x20e7   :  { %v1797_v17 = vadd.f32 %v2210_v8, %v1796_v16 }
0x20e9   :  { %v1801_v38 = vsel %vm1800_vm14, %v2210_v8, %v1797_v17 }
0x20ea   :  { %v1806_v30 = vsel %vm1803_vm15, %v1805_v22, %v1801_v38 }
0x20eb   :  { %v1809_v37 = vmul.f32 %v1806_v30, %v1756_v59 }
0x2148   :  { %v1812_v29 = vpop.permute.xlu0 %1811 }
0x2149   :  { %v1814_v31 = vmul.f32 %v1812_v29, %v1806_v30 }
0x214b   :  { %1816 = vrot.lane.b32.xlu1 %v1814_v31, %s2382_s30 }
0x21bd   :  { %v1817_v25 = vpop.permute.xlu1 %1816 }
0x21be   :  { %v1819_v24 = vadd.f32 %v1817_v25, %v1809_v37 }
0x21c0   :  { %2211 = vtanh.f32 %v1819_v24 }
0x21c6   :  { %v2212_v42 = vpop.eup %2211 }
0x21c7   :  { %1822 = vrot.lane.b32.xlu2 %v2212_v42, %s2383_s3 }
0x2221   :  { %v1823_v32 = vpop.permute.xlu2 %1822 }
0x2222   :  { %v1825_v35 = vmul.f32 %v1823_v32, %v1806_v30 }
0x2224   :  { %1827 = vrot.lane.b32.xlu0 %v1825_v35, %s2382_s30 }
0x2296   :  { %v1828_v45 = vpop.permute.xlu0 %1827 }
0x2297   :  { %2010 = vmatmul.msk.f32.vlgmr.msrb.gmra.mxu3 %vm115_vm0, %v1828_v45 }
0x231a   :  { %v1848_v15 = vpop.f32.mrf.mxu3 }
0x231b   :  { %v1851_v46 = vadd.f32 %v1848_v15, %v2785_v33 }
0x231d   :  { %2213 = vtanh.f32 %v1851_v46  ;;  %v2011_v34 = vmul.f32 -1.442695, %v1851_v46 }
0x231f   :  { %2215 = vpow2.f32 %v2011_v34 }
0x2323   :  { %v2214_v43 = vpop.eup %2213 }
0x2324   :  { %1874 = vrot.lane.b32.xlu1 %v2214_v43, %s2383_s3 }
0x2325   :  { %v2216_v47 = vpop.eup %2215 }
0x2326   :  { %v1855_v49 = vadd.f32 1.0, %v2216_v47 }
0x2328   :  { %2217 = vrcp.f32 %v1855_v49  ;;  %v1867_v50 = vand.u32 2147483648, %v1855_v49  ;;  %vm1861_vm2 = vweird.f32 %v1855_v49  ;;  %v1865_v36 = vand.u32 2147483647, %v1855_v49 }
0x232a   :  { %v1868_v7 = vor.u32 1.1754944e-38, %v1867_v50  ;;  %vm1866_vm4 = vcmp.eq.f32.partialorder %v1865_v36, 8.507059e+37 }
0x232e   :  { %v2218_v51 = vpop.eup %2217 }
0x232f   :  { %v1857_v52 = vmul.f32 %v2218_v51, %v1855_v49  ;;  %vm1862_vm1 = vweird.f32 %v2218_v51 }
0x2330   :  { %vm1863_vm3 = vmor %vm1861_vm2, %vm1862_vm1 }
0x2331   :  { %v1858_v53 = vsub.f32 1.0, %v1857_v52 }
0x2333   :  { %v1859_v23 = vmul.f32 %v2218_v51, %v1858_v53 }
0x2335   :  { %v1860_v20 = vadd.f32 %v2218_v51, %v1859_v23 }
0x2337   :  { %v1864_v33 = vsel %vm1863_vm3, %v2218_v51, %v1860_v20 }
0x2338   :  { %v1869_v13 = vsel %vm1866_vm4, %v1868_v7, %v1864_v33 }
0x2339   :  { %v1872_v54 = vmul.f32 %v1869_v13, %v1819_v24 }
0x2396   :  { %v1875_v10 = vpop.permute.xlu1 %1874 }
0x2397   :  { %v1877_v14 = vmul.f32 %v1875_v10, %v1869_v13 }
0x2399   :  { %1879 = vrot.lane.b32.xlu2 %v1877_v14, %s2382_s30 }
0x23f3   :  { %v1880_v55 = vpop.permute.xlu2 %1879 }
0x23f4   :  { %v1882_v56 = vadd.f32 %v1880_v55, %v1872_v54 }
0x23f6   :  { %2219 = vtanh.f32 %v1882_v56 }
0x23fc   :  { %v2220_v58 = vpop.eup %2219 }
0x23fd   :  { %1885 = vrot.lane.b32.xlu0 %v2220_v58, %s2383_s3 }
0x246f   :  { %v1886_v21 = vpop.permute.xlu0 %1885 }
0x2470   :  { %v1888_v27 = vmul.f32 %v1886_v21, %v1869_v13 }
0x2472   :  { %1893 = vrot.lane.b32.xlu1 %v1888_v27, %s2382_s30 }
0x24e4   :  { %v1894_v62 = vpop.permute.xlu1 %1893 }
0x24e5   :  { %v1897_v57 = vsel %vm1891_vm5, %v1894_v62, %v2791_v61 }
0x24e6   :  { %2012 = vmatmul.msk.f32.vlgmr.msra.gmra.mxu2 %vm115_vm0, %v1897_v57 }
0x2569   :  { %v1926_v59 = vpop.f32.mrf.mxu2 }
0x256a   :  { %v1927_v0 = vadd.f32 %v2028_v63, %v1926_v59 }
0x256c   :  { %1930 = vst.msk [vmem:[#allocation12] sm:$0x3] %vm1929_vm6, %v1927_v0 }
0x256d   :  { %1941 = dma.vmem_to_hbm [thread:$0]  %s1937_s22, 32, %s1939_s9, [#allocation5]  }
0x256e   :  { %2371 = dma.done.wait [#allocation5], 32  }
0x256f   :  { %2372 = vsyncadd [#allocation5], 4294967264 }
0x2570   :  { %1946 = vsyncpa [#allocation4], 1 }
0x2571   :  { %1947 = vsyncpa [#allocation7], 1 }
0x2572   :  { %1948 = vsyncpa [#allocation10], 1 }
0x2573   :  { %1949 = vsyncpa [#allocation5], 1 }

</bundles_post_ra>
